<compile_context>
chip_gen: v5e
topology: v5e:2x2
jax: 0.10.0
libtpu: 0.0.40
codegen_flags: <defaults>
</compile_context>

<pallas_src>
import functools

import jax
import jax.numpy as jnp
from jax import lax
from jax.experimental import pallas as pl
from jax.experimental.pallas import tpu as pltpu


def _eye3(n, dtype=jnp.float32):
    r = lax.broadcasted_iota(jnp.int32, (1, n, n), 1)
    c = lax.broadcasted_iota(jnp.int32, (1, n, n), 2)
    return (r == c).astype(dtype)


def _gauss_jordan_solve_multi(A, Bs):
    """Batched Gauss-Jordan elimination (no pivoting; A is SPD).

    A:  (Bb, n, n) f32.
    Bs: tuple of (Bb, n, k_i) f32 right-hand sides (row ops shared across all).
    Returns the tuple of solutions. Row/column extraction uses masked
    reductions, vectorized over the Bb batch block (no dynamic indexing).
    """
    n = A.shape[-1]
    row_ids = lax.broadcasted_iota(jnp.int32, (1, n, 1), 1)
    col_ids = lax.broadcasted_iota(jnp.int32, (1, 1, n), 2)

    def step(k, carry):
        A, Bs = carry
        row_mask = row_ids == k                                    # (1, n, 1)
        col_mask = col_ids == k                                    # (1, 1, n)
        pivot_row = jnp.sum(jnp.where(row_mask, A, 0.0),
                            axis=1, keepdims=True)                 # (Bb, 1, n)
        # cheap pivot: lane-masked reduce of the already-extracted pivot row
        pivot = jnp.sum(jnp.where(col_mask, pivot_row, 0.0),
                        axis=2, keepdims=True)                     # (Bb, 1, 1)
        inv_p = 1.0 / pivot        # exact divide (do NOT use approx reciprocal)
        norm_row = pivot_row * inv_p
        col = jnp.sum(jnp.where(col_mask, A, 0.0),
                      axis=2, keepdims=True)                       # (Bb, n, 1)
        factor = jnp.where(row_mask, 0.0, col)                     # (Bb, n, 1)
        A = jnp.where(row_mask, norm_row, A - factor * norm_row)
        new_Bs = []
        for B in Bs:
            b_row = jnp.sum(jnp.where(row_mask, B, 0.0),
                            axis=1, keepdims=True)                 # (Bb, 1, k)
            b_norm = b_row * inv_p
            new_Bs.append(jnp.where(row_mask, b_norm, B - factor * b_norm))
        return A, tuple(new_Bs)

    carry = (A, tuple(Bs))
    if n <= 32:
        # fully unrolled: short fixed trip-count, gives the scheduler visibility
        for k in range(n):
            carry = step(k, carry)
    else:
        carry = lax.fori_loop(0, n, step, carry)
    return carry[1]


def _ridge_primal_kernel(reg_ref, x_ref, y_ref, w_ref,
                         gram_acc, xty_acc, scol_acc, ysum_acc,
                         *, n_true, mask_rows):
    """n_samples >= n_dim branch.

    Grid = (batch_blocks, n_tiles); the N axis is a reduction ("arbitrary").
    Per N-tile accumulate X^T X, X^T Y, X^T 1, 1^T Y in f32 VMEM scratch; on
    the last tile solve the (implicitly ones-augmented) ridge system by block
    elimination:
        G = X^T X + reg I ; s = X^T 1 ; c = N + reg ; P = X^T Y ; t = 1^T Y
        U_P = G^-1 P ; U_s = G^-1 s
        bias = (t - s^T U_P) / (c - s^T U_s) ;  W = U_P - U_s * bias
    which is algebraically identical to solving the augmented (D+1) system the
    PyTorch module builds -- but needs no ones-concat in HBM or VMEM.
    """
    n_idx = pl.program_id(1)

    @pl.when(n_idx == 0)
    def _init():
        gram_acc[...] = jnp.zeros_like(gram_acc)
        xty_acc[...] = jnp.zeros_like(xty_acc)
        scol_acc[...] = jnp.zeros_like(scol_acc)
        ysum_acc[...] = jnp.zeros_like(ysum_acc)

    x = x_ref[...]                       # (Bb, TN, D) native dtype (bf16 stays bf16)
    y = y_ref[...]                       # (Bb, TN, K)
    if x.dtype != y.dtype:               # keep MXU operands consistent
        x = x.astype(jnp.float32)
        y = y.astype(jnp.float32)
    bb, tn, _ = x.shape

    if mask_rows:                        # last N-tile may be partial: zero padded rows
        row_local = lax.broadcasted_iota(jnp.int32, (1, tn, 1), 1)
        valid = (n_idx * tn + row_local) < n_true
        x = jnp.where(valid, x, jnp.zeros((), x.dtype))
        y = jnp.where(valid, y, jnp.zeros((), y.dtype))
        ones_col = jnp.broadcast_to(valid, (bb, tn, 1)).astype(x.dtype)
    else:
        ones_col = jnp.ones((bb, tn, 1), x.dtype)

    # f32 accumulation of the Gram / projection pieces (batched MXU matmuls)
    gram_acc[...] += jnp.einsum("bnd,bne->bde", x, x,
                                preferred_element_type=jnp.float32)
    xty_acc[...] += jnp.einsum("bnd,bnk->bdk", x, y,
                               preferred_element_type=jnp.float32)
    scol_acc[...] += jnp.einsum("bnd,bne->bde", x, ones_col,
                                preferred_element_type=jnp.float32)   # X^T 1
    ysum_acc[...] += jnp.sum(y.astype(jnp.float32), axis=1, keepdims=True)  # 1^T Y

    @pl.when(n_idx == pl.num_programs(1) - 1)
    def _solve():
        d = gram_acc.shape[-1]
        reg = reg_ref[0, 0]
        G = gram_acc[...] + reg * _eye3(d)                    # (Bb, D, D)
        s = scol_acc[...]                                     # (Bb, D, 1)
        U_P, U_s = _gauss_jordan_solve_multi(G, (xty_acc[...], s))
        sUp = jnp.sum(s * U_P, axis=1, keepdims=True)         # (Bb, 1, K)
        sUs = jnp.sum(s * U_s, axis=1, keepdims=True)         # (Bb, 1, 1)
        denom = (jnp.float32(n_true) + reg) - sUs             # Schur complement (> 0)
        bias = (ysum_acc[...] - sUp) / denom                  # (Bb, 1, K)
        # TODO(synk): for very large B, present a lane-dense (D1, Bb*K) output slab.
        w_ref[:, :d, :] = U_P - U_s * bias                    # weights
        w_ref[:, d:, :] = bias                                # bias row


def _ridge_dual_kernel(reg_ref, x_ref, y_ref, w_ref):
    """n_samples < n_dim branch: W = Xa^T (Xa Xa^T + reg I)^-1 Y with Xa=[X,1].

    Xa Xa^T = X X^T + 1*1^T, so the augmentation is just "+1.0" on the (N,N)
    Gram, and Xa^T Z = [X^T Z ; sum_n Z] -- again no concat anywhere.
    """
    x = x_ref[...]                         # (Bb, N, D) native dtype
    yf = y_ref[...].astype(jnp.float32)    # (Bb, N, K)
    bb, n, d = x.shape
    reg = reg_ref[0, 0]
    gram = jnp.einsum("bnd,bmd->bnm", x, x,
                      preferred_element_type=jnp.float32)      # X X^T
    A = gram + 1.0 + reg * _eye3(n)
    (Z,) = _gauss_jordan_solve_multi(A, (yf,))                 # (Bb, N, K)
    xf = x.astype(jnp.float32)
    w_ref[:, :d, :] = jnp.einsum("bnd,bnk->bdk", xf, Z,
                                 preferred_element_type=jnp.float32)
    w_ref[:, d:, :] = jnp.sum(Z, axis=1, keepdims=True)


def _largest_divisor_le(n, cap):
    cap = max(1, min(n, cap))
    for c in range(cap, 0, -1):
        if n % c == 0:
            return c
    return 1


def _choose_batch_block(B, N, D, K, itemsize, dual):
    """Batch elements processed per grid step (must divide B, capped by VMEM)."""
    budget = 4 * 1024 * 1024
    if dual:
        per_b = N * (D + K) * itemsize + N * N * 4 + N * (D + K) * 4
    else:
        per_b = D * D * 4 + D * (K + 2) * 4 + (K + 1) * 4
    cap = max(1, budget // max(1, per_b))
    return _largest_divisor_le(B, min(8, cap))


def _choose_n_tile(b_blk, N, D, K, itemsize):
    """N-tile size: ~2 MiB per pipelined input block (double-buffered by Pallas)."""
    budget = 2 * 1024 * 1024
    per_row = max(1, b_blk * (D + K) * itemsize)
    tn = budget // per_row
    tn = max(8, (tn // 8) * 8)
    if tn >= N:
        return N
    return int(tn)


def ridge_regressor_forward(reprs, x, lambda_init=0.0, reg_coeff=None):
    """Equivalent of RidgeRegressor.forward: returns (w, b)."""
    if reg_coeff is None:
        reg_coeff = jax.nn.softplus(jnp.asarray(lambda_init, jnp.float32))
    reg_arr = jnp.reshape(jnp.asarray(reg_coeff, jnp.float32), (1, 1))

    B, N, D = reprs.shape
    K = x.shape[-1]
    D1 = D + 1
    itemsize = jnp.dtype(reprs.dtype).itemsize
    vmem_limit = 48 * 1024 * 1024      # fits v7x's 64 MiB VMEM with headroom

    if N >= D:
        Bb = _choose_batch_block(B, N, D, K, itemsize, dual=False)
        TN = _choose_n_tile(Bb, N, D, K, itemsize)
        n_tiles = pl.cdiv(N, TN)
        mask_rows = (N % TN) != 0
        kernel = functools.partial(_ridge_primal_kernel,
                                   n_true=N, mask_rows=mask_rows)
        w_full = pl.pallas_call(
            kernel,
            out_shape=jax.ShapeDtypeStruct((B, D1, K), jnp.float32),
            grid=(B // Bb, n_tiles),
            in_specs=[
                pl.BlockSpec(memory_space=pltpu.MemorySpace.SMEM),     # reg scalar
                pl.BlockSpec((Bb, TN, D), lambda b, n: (b, n, 0)),     # reprs (native dtype)
                pl.BlockSpec((Bb, TN, K), lambda b, n: (b, n, 0)),     # targets
            ],
            out_specs=pl.BlockSpec((Bb, D1, K), lambda b, n: (b, 0, 0)),
            scratch_shapes=[
                pltpu.VMEM((Bb, D, D), jnp.float32),    # X^T X accumulator
                pltpu.VMEM((Bb, D, K), jnp.float32),    # X^T Y accumulator
                pltpu.VMEM((Bb, D, 1), jnp.float32),    # X^T 1 accumulator
                pltpu.VMEM((Bb, 1, K), jnp.float32),    # 1^T Y accumulator
            ],
            compiler_params=pltpu.CompilerParams(
                dimension_semantics=("parallel", "arbitrary"),
                vmem_limit_bytes=vmem_limit),
        )(reg_arr, reprs, x)
    else:
        Bb = _choose_batch_block(B, N, D, K, itemsize, dual=True)
        w_full = pl.pallas_call(
            _ridge_dual_kernel,
            out_shape=jax.ShapeDtypeStruct((B, D1, K), jnp.float32),
            grid=(B // Bb,),
            in_specs=[
                pl.BlockSpec(memory_space=pltpu.MemorySpace.SMEM),
                pl.BlockSpec((Bb, N, D), lambda b: (b, 0, 0)),
                pl.BlockSpec((Bb, N, K), lambda b: (b, 0, 0)),
            ],
            out_specs=pl.BlockSpec((Bb, D1, K), lambda b: (b, 0, 0)),
            compiler_params=pltpu.CompilerParams(
                dimension_semantics=("parallel",),
                vmem_limit_bytes=vmem_limit),
        )(reg_arr, reprs, x)

    return w_full[:, :-1], w_full[:, -1:]


def _ridge_reference(reprs, x, reg_coeff):
    """Pure-JAX reference mirroring the PyTorch module."""
    B, N, D = reprs.shape
    Xa = jnp.concatenate(
        [reprs.astype(jnp.float32), jnp.ones((B, N, 1), jnp.float32)], axis=-1)
    Y = x.astype(jnp.float32)
    if N >= D:
        A = jnp.einsum("bnd,bne->bde", Xa, Xa) + reg_coeff * jnp.eye(D + 1)
        Bm = jnp.einsum("bnd,bnk->bdk", Xa, Y)
        W = jnp.linalg.solve(A, Bm)
    else:
        A = jnp.einsum("bnd,bmd->bnm", Xa, Xa) + reg_coeff * jnp.eye(N)
        Z = jnp.linalg.solve(A, Y)
        W = jnp.einsum("bnd,bnk->bdk", Xa, Z)
    return W[:, :-1], W[:, -1:]


if __name__ == "__main__":
    key = jax.random.PRNGKey(0)
    k1, k2, k3, k4 = jax.random.split(key, 4)

    # deterministic "parameter": _lambda initialized to lambda_init = 0.0
    lambda_init = 0.0
    reg = float(jax.nn.softplus(jnp.float32(lambda_init)))

    # --- primal branch: n_samples >= n_dim ---
    B, N, D, K = 2, 16, 8, 4
    reprs = jax.random.normal(k1, (B, N, D), jnp.float32)
    targets = jax.random.normal(k2, (B, N, K), jnp.float32)
    w, b = ridge_regressor_forward(reprs, targets, lambda_init=lambda_init)
    jax.block_until_ready((w, b))
    w_ref, b_ref = _ridge_reference(reprs, targets, reg)
    assert w.shape == (B, D, K) and b.shape == (B, 1, K)
    assert jnp.allclose(w, w_ref, atol=2e-3, rtol=2e-3), "primal weights mismatch"
    assert jnp.allclose(b, b_ref, atol=2e-3, rtol=2e-3), "primal bias mismatch"

    # --- dual branch: n_samples < n_dim ---
    B2, N2, D2, K2 = 2, 4, 8, 4
    reprs2 = jax.random.normal(k3, (B2, N2, D2), jnp.float32)
    targets2 = jax.random.normal(k4, (B2, N2, K2), jnp.float32)
    w2, b2 = ridge_regressor_forward(reprs2, targets2, lambda_init=lambda_init)
    jax.block_until_ready((w2, b2))
    w2_ref, b2_ref = _ridge_reference(reprs2, targets2, reg)
    assert jnp.allclose(w2, w2_ref, atol=2e-3, rtol=2e-3), "dual weights mismatch"
    assert jnp.allclose(b2, b2_ref, atol=2e-3, rtol=2e-3), "dual bias mismatch"

    print("KERNEL_OK")
</pallas_src>

<mosaic_0001>
module attributes {stable_mosaic.version = 11 : i64} {
  func.func @_ridge_primal_kernel(%arg0: i32, %arg1: i32, %arg2: memref<1x1xf32, #tpu.memory_space<smem>>, %arg3: memref<2x16x8xf32, #tpu.memory_space<vmem>>, %arg4: memref<2x16x4xf32, #tpu.memory_space<vmem>>, %arg5: memref<2x9x4xf32, #tpu.memory_space<vmem>>, %arg6: memref<2x8x8xf32, #tpu.memory_space<vmem>>, %arg7: memref<2x8x4xf32, #tpu.memory_space<vmem>>, %arg8: memref<2x8x1xf32, #tpu.memory_space<vmem>>, %arg9: memref<2x1x4xf32, #tpu.memory_space<vmem>>) attributes {dimension_semantics = [#tpu.dimension_semantics<parallel>, #tpu.dimension_semantics<arbitrary>], iteration_bounds = array<i64: 1, 1>, scalar_prefetch = 0 : i64, scratch_operands = 4 : i64, tpu.core_type = #tpu.core_type<tc>, window_params = [{transform_indices = @transform_0, window_bounds = array<i64: 1, 1>}, {transform_indices = @transform_1, window_bounds = array<i64: 2, 16, 8>}, {transform_indices = @transform_2, window_bounds = array<i64: 2, 16, 4>}, {transform_indices = @transform_3, window_bounds = array<i64: 2, 9, 4>}]} {
    %c0_i32 = arith.constant 0 : i32
    %0 = arith.cmpi eq, %arg1, %c0_i32 : i32
    %1 = arith.extui %0 : i1 to i32
    %c0_i32_0 = arith.constant 0 : i32
    %2 = arith.cmpi ne, %1, %c0_i32_0 : i32
    scf.if %2 {
      %cst_36 = arith.constant 0.000000e+00 : f32
      %26 = vector.broadcast %cst_36 : f32 to vector<2x8x8xf32>
      %c0_37 = arith.constant 0 : index
      %c0_38 = arith.constant 0 : index
      %c0_39 = arith.constant 0 : index
      %27 = vector.load %arg6[%c0_37, %c0_38, %c0_39] : memref<2x8x8xf32, #tpu.memory_space<vmem>>, vector<2x8x8xf32>
      tpu.vector_store %arg6[%c0_37, %c0_38, %c0_39], %26 {strides = array<i32>} : memref<2x8x8xf32, #tpu.memory_space<vmem>>, vector<2x8x8xf32>,
      %cst_40 = arith.constant 0.000000e+00 : f32
      %28 = vector.broadcast %cst_40 : f32 to vector<2x8x4xf32>
      %c0_41 = arith.constant 0 : index
      %c0_42 = arith.constant 0 : index
      %c0_43 = arith.constant 0 : index
      %29 = vector.load %arg7[%c0_41, %c0_42, %c0_43] : memref<2x8x4xf32, #tpu.memory_space<vmem>>, vector<2x8x4xf32>
      tpu.vector_store %arg7[%c0_41, %c0_42, %c0_43], %28 {strides = array<i32>} : memref<2x8x4xf32, #tpu.memory_space<vmem>>, vector<2x8x4xf32>,
      %cst_44 = arith.constant 0.000000e+00 : f32
      %30 = vector.broadcast %cst_44 : f32 to vector<2x8x1xf32>
      %c0_45 = arith.constant 0 : index
      %c0_46 = arith.constant 0 : index
      %c0_47 = arith.constant 0 : index
      %31 = vector.load %arg8[%c0_45, %c0_46, %c0_47] : memref<2x8x1xf32, #tpu.memory_space<vmem>>, vector<2x8x1xf32>
      tpu.vector_store %arg8[%c0_45, %c0_46, %c0_47], %30 {strides = array<i32>} : memref<2x8x1xf32, #tpu.memory_space<vmem>>, vector<2x8x1xf32>,
      %cst_48 = arith.constant 0.000000e+00 : f32
      %32 = vector.broadcast %cst_48 : f32 to vector<2x1x4xf32>
      %c0_49 = arith.constant 0 : index
      %c0_50 = arith.constant 0 : index
      %c0_51 = arith.constant 0 : index
      %33 = vector.load %arg9[%c0_49, %c0_50, %c0_51] : memref<2x1x4xf32, #tpu.memory_space<vmem>>, vector<2x1x4xf32>
      tpu.vector_store %arg9[%c0_49, %c0_50, %c0_51], %32 {strides = array<i32>} : memref<2x1x4xf32, #tpu.memory_space<vmem>>, vector<2x1x4xf32>,
    } else {
    }
    %c0 = arith.constant 0 : index
    %c0_1 = arith.constant 0 : index
    %c0_2 = arith.constant 0 : index
    %3 = vector.load %arg3[%c0, %c0_1, %c0_2] : memref<2x16x8xf32, #tpu.memory_space<vmem>>, vector<2x16x8xf32>
    %c0_3 = arith.constant 0 : index
    %c0_4 = arith.constant 0 : index
    %c0_5 = arith.constant 0 : index
    %4 = vector.load %arg4[%c0_3, %c0_4, %c0_5] : memref<2x16x4xf32, #tpu.memory_space<vmem>>, vector<2x16x4xf32>
    %cst = arith.constant 1.000000e+00 : f32
    %5 = vector.broadcast %cst : f32 to vector<2x16x1xf32>
    %c0_6 = arith.constant 0 : index
    %c0_7 = arith.constant 0 : index
    %c0_8 = arith.constant 0 : index
    %6 = vector.load %arg6[%c0_6, %c0_7, %c0_8] : memref<2x8x8xf32, #tpu.memory_space<vmem>>, vector<2x8x8xf32>
    "tpu.trace_start"() <{level = 10 : i32, message = "bnd,bne->bde"}> : () -> ()
    %cst_9 = arith.constant dense<0.000000e+00> : vector<2x8x8xf32>
    %7 = tpu.matmul %3, %3, %cst_9 {dimension_numbers = #tpu.dot_dimension_numbers<[1], [1], [2], [2], [0, 0, 0, 2, 1, 2], [0], [0]>} : vector<2x16x8xf32>, vector<2x16x8xf32>, vector<2x8x8xf32> -> vector<2x8x8xf32>
    "tpu.trace_stop"() : () -> ()
    %8 = arith.addf %6, %7 : vector<2x8x8xf32>
    %c0_10 = arith.constant 0 : index
    %c0_11 = arith.constant 0 : index
    %c0_12 = arith.constant 0 : index
    %9 = vector.load %arg6[%c0_10, %c0_11, %c0_12] : memref<2x8x8xf32, #tpu.memory_space<vmem>>, vector<2x8x8xf32>
    tpu.vector_store %arg6[%c0_10, %c0_11, %c0_12], %8 {strides = array<i32>} : memref<2x8x8xf32, #tpu.memory_space<vmem>>, vector<2x8x8xf32>,
    %c0_13 = arith.constant 0 : index
    %c0_14 = arith.constant 0 : index
    %c0_15 = arith.constant 0 : index
    %10 = vector.load %arg7[%c0_13, %c0_14, %c0_15] : memref<2x8x4xf32, #tpu.memory_space<vmem>>, vector<2x8x4xf32>
    "tpu.trace_start"() <{level = 10 : i32, message = "bnd,bnk->bdk"}> : () -> ()
    %cst_16 = arith.constant dense<0.000000e+00> : vector<2x8x4xf32>
    %11 = tpu.matmul %3, %4, %cst_16 {dimension_numbers = #tpu.dot_dimension_numbers<[1], [1], [2], [2], [0, 0, 0, 2, 1, 2], [0], [0]>} : vector<2x16x8xf32>, vector<2x16x4xf32>, vector<2x8x4xf32> -> vector<2x8x4xf32>
    "tpu.trace_stop"() : () -> ()
    %12 = arith.addf %10, %11 : vector<2x8x4xf32>
    %c0_17 = arith.constant 0 : index
    %c0_18 = arith.constant 0 : index
    %c0_19 = arith.constant 0 : index
    %13 = vector.load %arg7[%c0_17, %c0_18, %c0_19] : memref<2x8x4xf32, #tpu.memory_space<vmem>>, vector<2x8x4xf32>
    tpu.vector_store %arg7[%c0_17, %c0_18, %c0_19], %12 {strides = array<i32>} : memref<2x8x4xf32, #tpu.memory_space<vmem>>, vector<2x8x4xf32>,
    %c0_20 = arith.constant 0 : index
    %c0_21 = arith.constant 0 : index
    %c0_22 = arith.constant 0 : index
    %14 = vector.load %arg8[%c0_20, %c0_21, %c0_22] : memref<2x8x1xf32, #tpu.memory_space<vmem>>, vector<2x8x1xf32>
    "tpu.trace_start"() <{level = 10 : i32, message = "bnd,bne->bde"}> : () -> ()
    %cst_23 = arith.constant dense<0.000000e+00> : vector<2x8x1xf32>
    %15 = tpu.matmul %3, %5, %cst_23 {dimension_numbers = #tpu.dot_dimension_numbers<[1], [1], [2], [2], [0, 0, 0, 2, 1, 2], [0], [0]>} : vector<2x16x8xf32>, vector<2x16x1xf32>, vector<2x8x1xf32> -> vector<2x8x1xf32>
    "tpu.trace_stop"() : () -> ()
    %16 = arith.addf %14, %15 : vector<2x8x1xf32>
    %c0_24 = arith.constant 0 : index
    %c0_25 = arith.constant 0 : index
    %c0_26 = arith.constant 0 : index
    %17 = vector.load %arg8[%c0_24, %c0_25, %c0_26] : memref<2x8x1xf32, #tpu.memory_space<vmem>>, vector<2x8x1xf32>
    tpu.vector_store %arg8[%c0_24, %c0_25, %c0_26], %16 {strides = array<i32>} : memref<2x8x1xf32, #tpu.memory_space<vmem>>, vector<2x8x1xf32>,
    %c0_27 = arith.constant 0 : index
    %c0_28 = arith.constant 0 : index
    %c0_29 = arith.constant 0 : index
    %18 = vector.load %arg9[%c0_27, %c0_28, %c0_29] : memref<2x1x4xf32, #tpu.memory_space<vmem>>, vector<2x1x4xf32>
    %cst_30 = arith.constant dense<0.000000e+00> : vector<2x4xf32>
    %19 = vector.multi_reduction <add>, %4, %cst_30 [1] : vector<2x16x4xf32> to vector<2x4xf32>
    %20 = vector.shape_cast %19 : vector<2x4xf32> to vector<2x1x4xf32>
    %21 = arith.addf %18, %20 : vector<2x1x4xf32>
    %c0_31 = arith.constant 0 : index
    %c0_32 = arith.constant 0 : index
    %c0_33 = arith.constant 0 : index
    %22 = vector.load %arg9[%c0_31, %c0_32, %c0_33] : memref<2x1x4xf32, #tpu.memory_space<vmem>>, vector<2x1x4xf32>
    tpu.vector_store %arg9[%c0_31, %c0_32, %c0_33], %21 {strides = array<i32>} : memref<2x1x4xf32, #tpu.memory_space<vmem>>, vector<2x1x4xf32>,
    %c0_i32_34 = arith.constant 0 : i32
    %23 = arith.cmpi eq, %arg1, %c0_i32_34 : i32
    %24 = arith.extui %23 : i1 to i32
    %c0_i32_35 = arith.constant 0 : i32
    %25 = arith.cmpi ne, %24, %c0_i32_35 : i32
    scf.if %25 {
      %c0_36 = arith.constant 0 : index
      %c0_37 = arith.constant 0 : index
      %26 = memref.load %arg2[%c0_36, %c0_37] : memref<1x1xf32, #tpu.memory_space<smem>>
      %c0_38 = arith.constant 0 : index
      %c0_39 = arith.constant 0 : index
      %c0_40 = arith.constant 0 : index
      %27 = vector.load %arg6[%c0_38, %c0_39, %c0_40] : memref<2x8x8xf32, #tpu.memory_space<vmem>>, vector<2x8x8xf32>
      %28 = tpu.iota {dimensions = array<i32: 1>} : vector<1x8x8xi32>
      %29 = tpu.iota {dimensions = array<i32: 2>} : vector<1x8x8xi32>
      %30 = arith.cmpi eq, %28, %29 : vector<1x8x8xi32>
      %31 = arith.extui %30 : vector<1x8x8xi1> to vector<1x8x8xi32>
      %32 = arith.sitofp %31 : vector<1x8x8xi32> to vector<1x8x8xf32>
      %33 = vector.broadcast %26 : f32 to vector<1x8x8xf32>
      %34 = arith.mulf %33, %32 : vector<1x8x8xf32>
      %35 = vector.broadcast %34 : vector<1x8x8xf32> to vector<2x8x8xf32>
      %36 = arith.addf %27, %35 : vector<2x8x8xf32>
      %c0_41 = arith.constant 0 : index
      %c0_42 = arith.constant 0 : index
      %c0_43 = arith.constant 0 : index
      %37 = vector.load %arg8[%c0_41, %c0_42, %c0_43] : memref<2x8x1xf32, #tpu.memory_space<vmem>>, vector<2x8x1xf32>
      %c0_44 = arith.constant 0 : index
      %c0_45 = arith.constant 0 : index
      %c0_46 = arith.constant 0 : index
      %38 = vector.load %arg7[%c0_44, %c0_45, %c0_46] : memref<2x8x4xf32, #tpu.memory_space<vmem>>, vector<2x8x4xf32>
      %39 = tpu.iota {dimensions = array<i32: 1>} : vector<1x8x1xi32>
      %40 = tpu.iota {dimensions = array<i32: 2>} : vector<1x1x8xi32>
      %c0_i32_47 = arith.constant 0 : i32
      %41 = vector.broadcast %c0_i32_47 : i32 to vector<1x8x1xi32>
      %42 = arith.cmpi eq, %39, %41 : vector<1x8x1xi32>
      %c0_i32_48 = arith.constant 0 : i32
      %43 = vector.broadcast %c0_i32_48 : i32 to vector<1x1x8xi32>
      %44 = arith.cmpi eq, %40, %43 : vector<1x1x8xi32>
      %cst_49 = arith.constant 0.000000e+00 : f32
      %45 = vector.shape_cast %42 : vector<1x8x1xi1> to vector<1x8x1xi1>
      %46 = vector.broadcast %45 : vector<1x8x1xi1> to vector<2x8x8xi1>
      %47 = vector.broadcast %cst_49 : f32 to vector<2x8x8xf32>
      %48 = arith.select %46, %36, %47 : vector<2x8x8xi1>, vector<2x8x8xf32>
      %cst_50 = arith.constant dense<0.000000e+00> : vector<2x8xf32>
      %49 = vector.multi_reduction <add>, %48, %cst_50 [1] : vector<2x8x8xf32> to vector<2x8xf32>
      %50 = vector.shape_cast %49 : vector<2x8xf32> to vector<2x1x8xf32>
      %cst_51 = arith.constant 0.000000e+00 : f32
      %51 = vector.shape_cast %44 : vector<1x1x8xi1> to vector<1x1x8xi1>
      %52 = vector.broadcast %51 : vector<1x1x8xi1> to vector<2x1x8xi1>
      %53 = vector.broadcast %cst_51 : f32 to vector<2x1x8xf32>
      %54 = arith.select %52, %50, %53 : vector<2x1x8xi1>, vector<2x1x8xf32>
      %cst_52 = arith.constant dense<0.000000e+00> : vector<2x1xf32>
      %55 = vector.multi_reduction <add>, %54, %cst_52 [2] : vector<2x1x8xf32> to vector<2x1xf32>
      %56 = vector.shape_cast %55 : vector<2x1xf32> to vector<2x1x1xf32>
      %cst_53 = arith.constant 1.000000e+00 : f32
      %57 = vector.broadcast %cst_53 : f32 to vector<2x1x1xf32>
      %58 = arith.divf %57, %56 : vector<2x1x1xf32>
      %59 = vector.broadcast %58 : vector<2x1x1xf32> to vector<2x1x8xf32>
      %60 = arith.mulf %50, %59 : vector<2x1x8xf32>
      %cst_54 = arith.constant 0.000000e+00 : f32
      %61 = vector.shape_cast %44 : vector<1x1x8xi1> to vector<1x1x8xi1>
      %62 = vector.broadcast %61 : vector<1x1x8xi1> to vector<2x8x8xi1>
      %63 = vector.broadcast %cst_54 : f32 to vector<2x8x8xf32>
      %64 = arith.select %62, %36, %63 : vector<2x8x8xi1>, vector<2x8x8xf32>
      %cst_55 = arith.constant dense<0.000000e+00> : vector<2x8xf32>
      %65 = vector.multi_reduction <add>, %64, %cst_55 [2] : vector<2x8x8xf32> to vector<2x8xf32>
      %66 = vector.shape_cast %65 : vector<2x8xf32> to vector<2x8x1xf32>
      %cst_56 = arith.constant 0.000000e+00 : f32
      %67 = vector.shape_cast %42 : vector<1x8x1xi1> to vector<1x8x1xi1>
      %68 = vector.broadcast %67 : vector<1x8x1xi1> to vector<2x8x1xi1>
      %69 = vector.broadcast %cst_56 : f32 to vector<2x8x1xf32>
      %70 = arith.select %68, %69, %66 : vector<2x8x1xi1>, vector<2x8x1xf32>
      %71 = vector.broadcast %70 : vector<2x8x1xf32> to vector<2x8x8xf32>
      %72 = vector.broadcast %60 : vector<2x1x8xf32> to vector<2x8x8xf32>
      %73 = arith.mulf %71, %72 : vector<2x8x8xf32>
      %74 = arith.subf %36, %73 : vector<2x8x8xf32>
      %75 = vector.shape_cast %42 : vector<1x8x1xi1> to vector<1x8x1xi1>
      %76 = vector.broadcast %75 : vector<1x8x1xi1> to vector<2x8x8xi1>
      %77 = vector.shape_cast %60 : vector<2x1x8xf32> to vector<2x1x8xf32>
      %78 = vector.broadcast %77 : vector<2x1x8xf32> to vector<2x8x8xf32>
      %79 = arith.select %76, %78, %74 : vector<2x8x8xi1>, vector<2x8x8xf32>
      %cst_57 = arith.constant 0.000000e+00 : f32
      %80 = vector.shape_cast %42 : vector<1x8x1xi1> to vector<1x8x1xi1>
      %81 = vector.broadcast %80 : vector<1x8x1xi1> to vector<2x8x4xi1>
      %82 = vector.broadcast %cst_57 : f32 to vector<2x8x4xf32>
      %83 = arith.select %81, %38, %82 : vector<2x8x4xi1>, vector<2x8x4xf32>
      %cst_58 = arith.constant dense<0.000000e+00> : vector<2x4xf32>
      %84 = vector.multi_reduction <add>, %83, %cst_58 [1] : vector<2x8x4xf32> to vector<2x4xf32>
      %85 = vector.shape_cast %84 : vector<2x4xf32> to vector<2x1x4xf32>
      %86 = vector.broadcast %58 : vector<2x1x1xf32> to vector<2x1x4xf32>
      %87 = arith.mulf %85, %86 : vector<2x1x4xf32>
      %88 = vector.broadcast %70 : vector<2x8x1xf32> to vector<2x8x4xf32>
      %89 = vector.broadcast %87 : vector<2x1x4xf32> to vector<2x8x4xf32>
      %90 = arith.mulf %88, %89 : vector<2x8x4xf32>
      %91 = arith.subf %38, %90 : vector<2x8x4xf32>
      %92 = vector.shape_cast %42 : vector<1x8x1xi1> to vector<1x8x1xi1>
      %93 = vector.broadcast %92 : vector<1x8x1xi1> to vector<2x8x4xi1>
      %94 = vector.shape_cast %87 : vector<2x1x4xf32> to vector<2x1x4xf32>
      %95 = vector.broadcast %94 : vector<2x1x4xf32> to vector<2x8x4xf32>
      %96 = arith.select %93, %95, %91 : vector<2x8x4xi1>, vector<2x8x4xf32>
      %cst_59 = arith.constant 0.000000e+00 : f32
      %97 = vector.shape_cast %42 : vector<1x8x1xi1> to vector<1x8x1xi1>
      %98 = vector.broadcast %97 : vector<1x8x1xi1> to vector<2x8x1xi1>
      %99 = vector.broadcast %cst_59 : f32 to vector<2x8x1xf32>
      %100 = arith.select %98, %37, %99 : vector<2x8x1xi1>, vector<2x8x1xf32>
      %cst_60 = arith.constant dense<0.000000e+00> : vector<2x1xf32>
      %101 = vector.multi_reduction <add>, %100, %cst_60 [1] : vector<2x8x1xf32> to vector<2x1xf32>
      %102 = vector.shape_cast %101 : vector<2x1xf32> to vector<2x1x1xf32>
      %103 = arith.mulf %102, %58 : vector<2x1x1xf32>
      %104 = vector.broadcast %103 : vector<2x1x1xf32> to vector<2x8x1xf32>
      %105 = arith.mulf %70, %104 : vector<2x8x1xf32>
      %106 = arith.subf %37, %105 : vector<2x8x1xf32>
      %107 = vector.shape_cast %42 : vector<1x8x1xi1> to vector<1x8x1xi1>
      %108 = vector.broadcast %107 : vector<1x8x1xi1> to vector<2x8x1xi1>
      %109 = vector.shape_cast %103 : vector<2x1x1xf32> to vector<2x1x1xf32>
      %110 = vector.broadcast %109 : vector<2x1x1xf32> to vector<2x8x1xf32>
      %111 = arith.select %108, %110, %106 : vector<2x8x1xi1>, vector<2x8x1xf32>
      %c1_i32 = arith.constant 1 : i32
      %112 = vector.broadcast %c1_i32 : i32 to vector<1x8x1xi32>
      %113 = arith.cmpi eq, %39, %112 : vector<1x8x1xi32>
      %c1_i32_61 = arith.constant 1 : i32
      %114 = vector.broadcast %c1_i32_61 : i32 to vector<1x1x8xi32>
      %115 = arith.cmpi eq, %40, %114 : vector<1x1x8xi32>
      %cst_62 = arith.constant 0.000000e+00 : f32
      %116 = vector.shape_cast %113 : vector<1x8x1xi1> to vector<1x8x1xi1>
      %117 = vector.broadcast %116 : vector<1x8x1xi1> to vector<2x8x8xi1>
      %118 = vector.broadcast %cst_62 : f32 to vector<2x8x8xf32>
      %119 = arith.select %117, %79, %118 : vector<2x8x8xi1>, vector<2x8x8xf32>
      %cst_63 = arith.constant dense<0.000000e+00> : vector<2x8xf32>
      %120 = vector.multi_reduction <add>, %119, %cst_63 [1] : vector<2x8x8xf32> to vector<2x8xf32>
      %121 = vector.shape_cast %120 : vector<2x8xf32> to vector<2x1x8xf32>
      %cst_64 = arith.constant 0.000000e+00 : f32
      %122 = vector.shape_cast %115 : vector<1x1x8xi1> to vector<1x1x8xi1>
      %123 = vector.broadcast %122 : vector<1x1x8xi1> to vector<2x1x8xi1>
      %124 = vector.broadcast %cst_64 : f32 to vector<2x1x8xf32>
      %125 = arith.select %123, %121, %124 : vector<2x1x8xi1>, vector<2x1x8xf32>
      %cst_65 = arith.constant dense<0.000000e+00> : vector<2x1xf32>
      %126 = vector.multi_reduction <add>, %125, %cst_65 [2] : vector<2x1x8xf32> to vector<2x1xf32>
      %127 = vector.shape_cast %126 : vector<2x1xf32> to vector<2x1x1xf32>
      %cst_66 = arith.constant 1.000000e+00 : f32
      %128 = vector.broadcast %cst_66 : f32 to vector<2x1x1xf32>
      %129 = arith.divf %128, %127 : vector<2x1x1xf32>
      %130 = vector.broadcast %129 : vector<2x1x1xf32> to vector<2x1x8xf32>
      %131 = arith.mulf %121, %130 : vector<2x1x8xf32>
      %cst_67 = arith.constant 0.000000e+00 : f32
      %132 = vector.shape_cast %115 : vector<1x1x8xi1> to vector<1x1x8xi1>
      %133 = vector.broadcast %132 : vector<1x1x8xi1> to vector<2x8x8xi1>
      %134 = vector.broadcast %cst_67 : f32 to vector<2x8x8xf32>
      %135 = arith.select %133, %79, %134 : vector<2x8x8xi1>, vector<2x8x8xf32>
      %cst_68 = arith.constant dense<0.000000e+00> : vector<2x8xf32>
      %136 = vector.multi_reduction <add>, %135, %cst_68 [2] : vector<2x8x8xf32> to vector<2x8xf32>
      %137 = vector.shape_cast %136 : vector<2x8xf32> to vector<2x8x1xf32>
      %cst_69 = arith.constant 0.000000e+00 : f32
      %138 = vector.shape_cast %113 : vector<1x8x1xi1> to vector<1x8x1xi1>
      %139 = vector.broadcast %138 : vector<1x8x1xi1> to vector<2x8x1xi1>
      %140 = vector.broadcast %cst_69 : f32 to vector<2x8x1xf32>
      %141 = arith.select %139, %140, %137 : vector<2x8x1xi1>, vector<2x8x1xf32>
      %142 = vector.broadcast %141 : vector<2x8x1xf32> to vector<2x8x8xf32>
      %143 = vector.broadcast %131 : vector<2x1x8xf32> to vector<2x8x8xf32>
      %144 = arith.mulf %142, %143 : vector<2x8x8xf32>
      %145 = arith.subf %79, %144 : vector<2x8x8xf32>
      %146 = vector.shape_cast %113 : vector<1x8x1xi1> to vector<1x8x1xi1>
      %147 = vector.broadcast %146 : vector<1x8x1xi1> to vector<2x8x8xi1>
      %148 = vector.shape_cast %131 : vector<2x1x8xf32> to vector<2x1x8xf32>
      %149 = vector.broadcast %148 : vector<2x1x8xf32> to vector<2x8x8xf32>
      %150 = arith.select %147, %149, %145 : vector<2x8x8xi1>, vector<2x8x8xf32>
      %cst_70 = arith.constant 0.000000e+00 : f32
      %151 = vector.shape_cast %113 : vector<1x8x1xi1> to vector<1x8x1xi1>
      %152 = vector.broadcast %151 : vector<1x8x1xi1> to vector<2x8x4xi1>
      %153 = vector.broadcast %cst_70 : f32 to vector<2x8x4xf32>
      %154 = arith.select %152, %96, %153 : vector<2x8x4xi1>, vector<2x8x4xf32>
      %cst_71 = arith.constant dense<0.000000e+00> : vector<2x4xf32>
      %155 = vector.multi_reduction <add>, %154, %cst_71 [1] : vector<2x8x4xf32> to vector<2x4xf32>
      %156 = vector.shape_cast %155 : vector<2x4xf32> to vector<2x1x4xf32>
      %157 = vector.broadcast %129 : vector<2x1x1xf32> to vector<2x1x4xf32>
      %158 = arith.mulf %156, %157 : vector<2x1x4xf32>
      %159 = vector.broadcast %141 : vector<2x8x1xf32> to vector<2x8x4xf32>
      %160 = vector.broadcast %158 : vector<2x1x4xf32> to vector<2x8x4xf32>
      %161 = arith.mulf %159, %160 : vector<2x8x4xf32>
      %162 = arith.subf %96, %161 : vector<2x8x4xf32>
      %163 = vector.shape_cast %113 : vector<1x8x1xi1> to vector<1x8x1xi1>
      %164 = vector.broadcast %163 : vector<1x8x1xi1> to vector<2x8x4xi1>
      %165 = vector.shape_cast %158 : vector<2x1x4xf32> to vector<2x1x4xf32>
      %166 = vector.broadcast %165 : vector<2x1x4xf32> to vector<2x8x4xf32>
      %167 = arith.select %164, %166, %162 : vector<2x8x4xi1>, vector<2x8x4xf32>
      %cst_72 = arith.constant 0.000000e+00 : f32
      %168 = vector.shape_cast %113 : vector<1x8x1xi1> to vector<1x8x1xi1>
      %169 = vector.broadcast %168 : vector<1x8x1xi1> to vector<2x8x1xi1>
      %170 = vector.broadcast %cst_72 : f32 to vector<2x8x1xf32>
      %171 = arith.select %169, %111, %170 : vector<2x8x1xi1>, vector<2x8x1xf32>
      %cst_73 = arith.constant dense<0.000000e+00> : vector<2x1xf32>
      %172 = vector.multi_reduction <add>, %171, %cst_73 [1] : vector<2x8x1xf32> to vector<2x1xf32>
      %173 = vector.shape_cast %172 : vector<2x1xf32> to vector<2x1x1xf32>
      %174 = arith.mulf %173, %129 : vector<2x1x1xf32>
      %175 = vector.broadcast %174 : vector<2x1x1xf32> to vector<2x8x1xf32>
      %176 = arith.mulf %141, %175 : vector<2x8x1xf32>
      %177 = arith.subf %111, %176 : vector<2x8x1xf32>
      %178 = vector.shape_cast %113 : vector<1x8x1xi1> to vector<1x8x1xi1>
      %179 = vector.broadcast %178 : vector<1x8x1xi1> to vector<2x8x1xi1>
      %180 = vector.shape_cast %174 : vector<2x1x1xf32> to vector<2x1x1xf32>
      %181 = vector.broadcast %180 : vector<2x1x1xf32> to vector<2x8x1xf32>
      %182 = arith.select %179, %181, %177 : vector<2x8x1xi1>, vector<2x8x1xf32>
      %c2_i32 = arith.constant 2 : i32
      %183 = vector.broadcast %c2_i32 : i32 to vector<1x8x1xi32>
      %184 = arith.cmpi eq, %39, %183 : vector<1x8x1xi32>
      %c2_i32_74 = arith.constant 2 : i32
      %185 = vector.broadcast %c2_i32_74 : i32 to vector<1x1x8xi32>
      %186 = arith.cmpi eq, %40, %185 : vector<1x1x8xi32>
      %cst_75 = arith.constant 0.000000e+00 : f32
      %187 = vector.shape_cast %184 : vector<1x8x1xi1> to vector<1x8x1xi1>
      %188 = vector.broadcast %187 : vector<1x8x1xi1> to vector<2x8x8xi1>
      %189 = vector.broadcast %cst_75 : f32 to vector<2x8x8xf32>
      %190 = arith.select %188, %150, %189 : vector<2x8x8xi1>, vector<2x8x8xf32>
      %cst_76 = arith.constant dense<0.000000e+00> : vector<2x8xf32>
      %191 = vector.multi_reduction <add>, %190, %cst_76 [1] : vector<2x8x8xf32> to vector<2x8xf32>
      %192 = vector.shape_cast %191 : vector<2x8xf32> to vector<2x1x8xf32>
      %cst_77 = arith.constant 0.000000e+00 : f32
      %193 = vector.shape_cast %186 : vector<1x1x8xi1> to vector<1x1x8xi1>
      %194 = vector.broadcast %193 : vector<1x1x8xi1> to vector<2x1x8xi1>
      %195 = vector.broadcast %cst_77 : f32 to vector<2x1x8xf32>
      %196 = arith.select %194, %192, %195 : vector<2x1x8xi1>, vector<2x1x8xf32>
      %cst_78 = arith.constant dense<0.000000e+00> : vector<2x1xf32>
      %197 = vector.multi_reduction <add>, %196, %cst_78 [2] : vector<2x1x8xf32> to vector<2x1xf32>
      %198 = vector.shape_cast %197 : vector<2x1xf32> to vector<2x1x1xf32>
      %cst_79 = arith.constant 1.000000e+00 : f32
      %199 = vector.broadcast %cst_79 : f32 to vector<2x1x1xf32>
      %200 = arith.divf %199, %198 : vector<2x1x1xf32>
      %201 = vector.broadcast %200 : vector<2x1x1xf32> to vector<2x1x8xf32>
      %202 = arith.mulf %192, %201 : vector<2x1x8xf32>
      %cst_80 = arith.constant 0.000000e+00 : f32
      %203 = vector.shape_cast %186 : vector<1x1x8xi1> to vector<1x1x8xi1>
      %204 = vector.broadcast %203 : vector<1x1x8xi1> to vector<2x8x8xi1>
      %205 = vector.broadcast %cst_80 : f32 to vector<2x8x8xf32>
      %206 = arith.select %204, %150, %205 : vector<2x8x8xi1>, vector<2x8x8xf32>
      %cst_81 = arith.constant dense<0.000000e+00> : vector<2x8xf32>
      %207 = vector.multi_reduction <add>, %206, %cst_81 [2] : vector<2x8x8xf32> to vector<2x8xf32>
      %208 = vector.shape_cast %207 : vector<2x8xf32> to vector<2x8x1xf32>
      %cst_82 = arith.constant 0.000000e+00 : f32
      %209 = vector.shape_cast %184 : vector<1x8x1xi1> to vector<1x8x1xi1>
      %210 = vector.broadcast %209 : vector<1x8x1xi1> to vector<2x8x1xi1>
      %211 = vector.broadcast %cst_82 : f32 to vector<2x8x1xf32>
      %212 = arith.select %210, %211, %208 : vector<2x8x1xi1>, vector<2x8x1xf32>
      %213 = vector.broadcast %212 : vector<2x8x1xf32> to vector<2x8x8xf32>
      %214 = vector.broadcast %202 : vector<2x1x8xf32> to vector<2x8x8xf32>
      %215 = arith.mulf %213, %214 : vector<2x8x8xf32>
      %216 = arith.subf %150, %215 : vector<2x8x8xf32>
      %217 = vector.shape_cast %184 : vector<1x8x1xi1> to vector<1x8x1xi1>
      %218 = vector.broadcast %217 : vector<1x8x1xi1> to vector<2x8x8xi1>
      %219 = vector.shape_cast %202 : vector<2x1x8xf32> to vector<2x1x8xf32>
      %220 = vector.broadcast %219 : vector<2x1x8xf32> to vector<2x8x8xf32>
      %221 = arith.select %218, %220, %216 : vector<2x8x8xi1>, vector<2x8x8xf32>
      %cst_83 = arith.constant 0.000000e+00 : f32
      %222 = vector.shape_cast %184 : vector<1x8x1xi1> to vector<1x8x1xi1>
      %223 = vector.broadcast %222 : vector<1x8x1xi1> to vector<2x8x4xi1>
      %224 = vector.broadcast %cst_83 : f32 to vector<2x8x4xf32>
      %225 = arith.select %223, %167, %224 : vector<2x8x4xi1>, vector<2x8x4xf32>
      %cst_84 = arith.constant dense<0.000000e+00> : vector<2x4xf32>
      %226 = vector.multi_reduction <add>, %225, %cst_84 [1] : vector<2x8x4xf32> to vector<2x4xf32>
      %227 = vector.shape_cast %226 : vector<2x4xf32> to vector<2x1x4xf32>
      %228 = vector.broadcast %200 : vector<2x1x1xf32> to vector<2x1x4xf32>
      %229 = arith.mulf %227, %228 : vector<2x1x4xf32>
      %230 = vector.broadcast %212 : vector<2x8x1xf32> to vector<2x8x4xf32>
      %231 = vector.broadcast %229 : vector<2x1x4xf32> to vector<2x8x4xf32>
      %232 = arith.mulf %230, %231 : vector<2x8x4xf32>
      %233 = arith.subf %167, %232 : vector<2x8x4xf32>
      %234 = vector.shape_cast %184 : vector<1x8x1xi1> to vector<1x8x1xi1>
      %235 = vector.broadcast %234 : vector<1x8x1xi1> to vector<2x8x4xi1>
      %236 = vector.shape_cast %229 : vector<2x1x4xf32> to vector<2x1x4xf32>
      %237 = vector.broadcast %236 : vector<2x1x4xf32> to vector<2x8x4xf32>
      %238 = arith.select %235, %237, %233 : vector<2x8x4xi1>, vector<2x8x4xf32>
      %cst_85 = arith.constant 0.000000e+00 : f32
      %239 = vector.shape_cast %184 : vector<1x8x1xi1> to vector<1x8x1xi1>
      %240 = vector.broadcast %239 : vector<1x8x1xi1> to vector<2x8x1xi1>
      %241 = vector.broadcast %cst_85 : f32 to vector<2x8x1xf32>
      %242 = arith.select %240, %182, %241 : vector<2x8x1xi1>, vector<2x8x1xf32>
      %cst_86 = arith.constant dense<0.000000e+00> : vector<2x1xf32>
      %243 = vector.multi_reduction <add>, %242, %cst_86 [1] : vector<2x8x1xf32> to vector<2x1xf32>
      %244 = vector.shape_cast %243 : vector<2x1xf32> to vector<2x1x1xf32>
      %245 = arith.mulf %244, %200 : vector<2x1x1xf32>
      %246 = vector.broadcast %245 : vector<2x1x1xf32> to vector<2x8x1xf32>
      %247 = arith.mulf %212, %246 : vector<2x8x1xf32>
      %248 = arith.subf %182, %247 : vector<2x8x1xf32>
      %249 = vector.shape_cast %184 : vector<1x8x1xi1> to vector<1x8x1xi1>
      %250 = vector.broadcast %249 : vector<1x8x1xi1> to vector<2x8x1xi1>
      %251 = vector.shape_cast %245 : vector<2x1x1xf32> to vector<2x1x1xf32>
      %252 = vector.broadcast %251 : vector<2x1x1xf32> to vector<2x8x1xf32>
      %253 = arith.select %250, %252, %248 : vector<2x8x1xi1>, vector<2x8x1xf32>
      %c3_i32 = arith.constant 3 : i32
      %254 = vector.broadcast %c3_i32 : i32 to vector<1x8x1xi32>
      %255 = arith.cmpi eq, %39, %254 : vector<1x8x1xi32>
      %c3_i32_87 = arith.constant 3 : i32
      %256 = vector.broadcast %c3_i32_87 : i32 to vector<1x1x8xi32>
      %257 = arith.cmpi eq, %40, %256 : vector<1x1x8xi32>
      %cst_88 = arith.constant 0.000000e+00 : f32
      %258 = vector.shape_cast %255 : vector<1x8x1xi1> to vector<1x8x1xi1>
      %259 = vector.broadcast %258 : vector<1x8x1xi1> to vector<2x8x8xi1>
      %260 = vector.broadcast %cst_88 : f32 to vector<2x8x8xf32>
      %261 = arith.select %259, %221, %260 : vector<2x8x8xi1>, vector<2x8x8xf32>
      %cst_89 = arith.constant dense<0.000000e+00> : vector<2x8xf32>
      %262 = vector.multi_reduction <add>, %261, %cst_89 [1] : vector<2x8x8xf32> to vector<2x8xf32>
      %263 = vector.shape_cast %262 : vector<2x8xf32> to vector<2x1x8xf32>
      %cst_90 = arith.constant 0.000000e+00 : f32
      %264 = vector.shape_cast %257 : vector<1x1x8xi1> to vector<1x1x8xi1>
      %265 = vector.broadcast %264 : vector<1x1x8xi1> to vector<2x1x8xi1>
      %266 = vector.broadcast %cst_90 : f32 to vector<2x1x8xf32>
      %267 = arith.select %265, %263, %266 : vector<2x1x8xi1>, vector<2x1x8xf32>
      %cst_91 = arith.constant dense<0.000000e+00> : vector<2x1xf32>
      %268 = vector.multi_reduction <add>, %267, %cst_91 [2] : vector<2x1x8xf32> to vector<2x1xf32>
      %269 = vector.shape_cast %268 : vector<2x1xf32> to vector<2x1x1xf32>
      %cst_92 = arith.constant 1.000000e+00 : f32
      %270 = vector.broadcast %cst_92 : f32 to vector<2x1x1xf32>
      %271 = arith.divf %270, %269 : vector<2x1x1xf32>
      %272 = vector.broadcast %271 : vector<2x1x1xf32> to vector<2x1x8xf32>
      %273 = arith.mulf %263, %272 : vector<2x1x8xf32>
      %cst_93 = arith.constant 0.000000e+00 : f32
      %274 = vector.shape_cast %257 : vector<1x1x8xi1> to vector<1x1x8xi1>
      %275 = vector.broadcast %274 : vector<1x1x8xi1> to vector<2x8x8xi1>
      %276 = vector.broadcast %cst_93 : f32 to vector<2x8x8xf32>
      %277 = arith.select %275, %221, %276 : vector<2x8x8xi1>, vector<2x8x8xf32>
      %cst_94 = arith.constant dense<0.000000e+00> : vector<2x8xf32>
      %278 = vector.multi_reduction <add>, %277, %cst_94 [2] : vector<2x8x8xf32> to vector<2x8xf32>
      %279 = vector.shape_cast %278 : vector<2x8xf32> to vector<2x8x1xf32>
      %cst_95 = arith.constant 0.000000e+00 : f32
      %280 = vector.shape_cast %255 : vector<1x8x1xi1> to vector<1x8x1xi1>
      %281 = vector.broadcast %280 : vector<1x8x1xi1> to vector<2x8x1xi1>
      %282 = vector.broadcast %cst_95 : f32 to vector<2x8x1xf32>
      %283 = arith.select %281, %282, %279 : vector<2x8x1xi1>, vector<2x8x1xf32>
      %284 = vector.broadcast %283 : vector<2x8x1xf32> to vector<2x8x8xf32>
      %285 = vector.broadcast %273 : vector<2x1x8xf32> to vector<2x8x8xf32>
      %286 = arith.mulf %284, %285 : vector<2x8x8xf32>
      %287 = arith.subf %221, %286 : vector<2x8x8xf32>
      %288 = vector.shape_cast %255 : vector<1x8x1xi1> to vector<1x8x1xi1>
      %289 = vector.broadcast %288 : vector<1x8x1xi1> to vector<2x8x8xi1>
      %290 = vector.shape_cast %273 : vector<2x1x8xf32> to vector<2x1x8xf32>
      %291 = vector.broadcast %290 : vector<2x1x8xf32> to vector<2x8x8xf32>
      %292 = arith.select %289, %291, %287 : vector<2x8x8xi1>, vector<2x8x8xf32>
      %cst_96 = arith.constant 0.000000e+00 : f32
      %293 = vector.shape_cast %255 : vector<1x8x1xi1> to vector<1x8x1xi1>
      %294 = vector.broadcast %293 : vector<1x8x1xi1> to vector<2x8x4xi1>
      %295 = vector.broadcast %cst_96 : f32 to vector<2x8x4xf32>
      %296 = arith.select %294, %238, %295 : vector<2x8x4xi1>, vector<2x8x4xf32>
      %cst_97 = arith.constant dense<0.000000e+00> : vector<2x4xf32>
      %297 = vector.multi_reduction <add>, %296, %cst_97 [1] : vector<2x8x4xf32> to vector<2x4xf32>
      %298 = vector.shape_cast %297 : vector<2x4xf32> to vector<2x1x4xf32>
      %299 = vector.broadcast %271 : vector<2x1x1xf32> to vector<2x1x4xf32>
      %300 = arith.mulf %298, %299 : vector<2x1x4xf32>
      %301 = vector.broadcast %283 : vector<2x8x1xf32> to vector<2x8x4xf32>
      %302 = vector.broadcast %300 : vector<2x1x4xf32> to vector<2x8x4xf32>
      %303 = arith.mulf %301, %302 : vector<2x8x4xf32>
      %304 = arith.subf %238, %303 : vector<2x8x4xf32>
      %305 = vector.shape_cast %255 : vector<1x8x1xi1> to vector<1x8x1xi1>
      %306 = vector.broadcast %305 : vector<1x8x1xi1> to vector<2x8x4xi1>
      %307 = vector.shape_cast %300 : vector<2x1x4xf32> to vector<2x1x4xf32>
      %308 = vector.broadcast %307 : vector<2x1x4xf32> to vector<2x8x4xf32>
      %309 = arith.select %306, %308, %304 : vector<2x8x4xi1>, vector<2x8x4xf32>
      %cst_98 = arith.constant 0.000000e+00 : f32
      %310 = vector.shape_cast %255 : vector<1x8x1xi1> to vector<1x8x1xi1>
      %311 = vector.broadcast %310 : vector<1x8x1xi1> to vector<2x8x1xi1>
      %312 = vector.broadcast %cst_98 : f32 to vector<2x8x1xf32>
      %313 = arith.select %311, %253, %312 : vector<2x8x1xi1>, vector<2x8x1xf32>
      %cst_99 = arith.constant dense<0.000000e+00> : vector<2x1xf32>
      %314 = vector.multi_reduction <add>, %313, %cst_99 [1] : vector<2x8x1xf32> to vector<2x1xf32>
      %315 = vector.shape_cast %314 : vector<2x1xf32> to vector<2x1x1xf32>
      %316 = arith.mulf %315, %271 : vector<2x1x1xf32>
      %317 = vector.broadcast %316 : vector<2x1x1xf32> to vector<2x8x1xf32>
      %318 = arith.mulf %283, %317 : vector<2x8x1xf32>
      %319 = arith.subf %253, %318 : vector<2x8x1xf32>
      %320 = vector.shape_cast %255 : vector<1x8x1xi1> to vector<1x8x1xi1>
      %321 = vector.broadcast %320 : vector<1x8x1xi1> to vector<2x8x1xi1>
      %322 = vector.shape_cast %316 : vector<2x1x1xf32> to vector<2x1x1xf32>
      %323 = vector.broadcast %322 : vector<2x1x1xf32> to vector<2x8x1xf32>
      %324 = arith.select %321, %323, %319 : vector<2x8x1xi1>, vector<2x8x1xf32>
      %c4_i32 = arith.constant 4 : i32
      %325 = vector.broadcast %c4_i32 : i32 to vector<1x8x1xi32>
      %326 = arith.cmpi eq, %39, %325 : vector<1x8x1xi32>
      %c4_i32_100 = arith.constant 4 : i32
      %327 = vector.broadcast %c4_i32_100 : i32 to vector<1x1x8xi32>
      %328 = arith.cmpi eq, %40, %327 : vector<1x1x8xi32>
      %cst_101 = arith.constant 0.000000e+00 : f32
      %329 = vector.shape_cast %326 : vector<1x8x1xi1> to vector<1x8x1xi1>
      %330 = vector.broadcast %329 : vector<1x8x1xi1> to vector<2x8x8xi1>
      %331 = vector.broadcast %cst_101 : f32 to vector<2x8x8xf32>
      %332 = arith.select %330, %292, %331 : vector<2x8x8xi1>, vector<2x8x8xf32>
      %cst_102 = arith.constant dense<0.000000e+00> : vector<2x8xf32>
      %333 = vector.multi_reduction <add>, %332, %cst_102 [1] : vector<2x8x8xf32> to vector<2x8xf32>
      %334 = vector.shape_cast %333 : vector<2x8xf32> to vector<2x1x8xf32>
      %cst_103 = arith.constant 0.000000e+00 : f32
      %335 = vector.shape_cast %328 : vector<1x1x8xi1> to vector<1x1x8xi1>
      %336 = vector.broadcast %335 : vector<1x1x8xi1> to vector<2x1x8xi1>
      %337 = vector.broadcast %cst_103 : f32 to vector<2x1x8xf32>
      %338 = arith.select %336, %334, %337 : vector<2x1x8xi1>, vector<2x1x8xf32>
      %cst_104 = arith.constant dense<0.000000e+00> : vector<2x1xf32>
      %339 = vector.multi_reduction <add>, %338, %cst_104 [2] : vector<2x1x8xf32> to vector<2x1xf32>
      %340 = vector.shape_cast %339 : vector<2x1xf32> to vector<2x1x1xf32>
      %cst_105 = arith.constant 1.000000e+00 : f32
      %341 = vector.broadcast %cst_105 : f32 to vector<2x1x1xf32>
      %342 = arith.divf %341, %340 : vector<2x1x1xf32>
      %343 = vector.broadcast %342 : vector<2x1x1xf32> to vector<2x1x8xf32>
      %344 = arith.mulf %334, %343 : vector<2x1x8xf32>
      %cst_106 = arith.constant 0.000000e+00 : f32
      %345 = vector.shape_cast %328 : vector<1x1x8xi1> to vector<1x1x8xi1>
      %346 = vector.broadcast %345 : vector<1x1x8xi1> to vector<2x8x8xi1>
      %347 = vector.broadcast %cst_106 : f32 to vector<2x8x8xf32>
      %348 = arith.select %346, %292, %347 : vector<2x8x8xi1>, vector<2x8x8xf32>
      %cst_107 = arith.constant dense<0.000000e+00> : vector<2x8xf32>
      %349 = vector.multi_reduction <add>, %348, %cst_107 [2] : vector<2x8x8xf32> to vector<2x8xf32>
      %350 = vector.shape_cast %349 : vector<2x8xf32> to vector<2x8x1xf32>
      %cst_108 = arith.constant 0.000000e+00 : f32
      %351 = vector.shape_cast %326 : vector<1x8x1xi1> to vector<1x8x1xi1>
      %352 = vector.broadcast %351 : vector<1x8x1xi1> to vector<2x8x1xi1>
      %353 = vector.broadcast %cst_108 : f32 to vector<2x8x1xf32>
      %354 = arith.select %352, %353, %350 : vector<2x8x1xi1>, vector<2x8x1xf32>
      %355 = vector.broadcast %354 : vector<2x8x1xf32> to vector<2x8x8xf32>
      %356 = vector.broadcast %344 : vector<2x1x8xf32> to vector<2x8x8xf32>
      %357 = arith.mulf %355, %356 : vector<2x8x8xf32>
      %358 = arith.subf %292, %357 : vector<2x8x8xf32>
      %359 = vector.shape_cast %326 : vector<1x8x1xi1> to vector<1x8x1xi1>
      %360 = vector.broadcast %359 : vector<1x8x1xi1> to vector<2x8x8xi1>
      %361 = vector.shape_cast %344 : vector<2x1x8xf32> to vector<2x1x8xf32>
      %362 = vector.broadcast %361 : vector<2x1x8xf32> to vector<2x8x8xf32>
      %363 = arith.select %360, %362, %358 : vector<2x8x8xi1>, vector<2x8x8xf32>
      %cst_109 = arith.constant 0.000000e+00 : f32
      %364 = vector.shape_cast %326 : vector<1x8x1xi1> to vector<1x8x1xi1>
      %365 = vector.broadcast %364 : vector<1x8x1xi1> to vector<2x8x4xi1>
      %366 = vector.broadcast %cst_109 : f32 to vector<2x8x4xf32>
      %367 = arith.select %365, %309, %366 : vector<2x8x4xi1>, vector<2x8x4xf32>
      %cst_110 = arith.constant dense<0.000000e+00> : vector<2x4xf32>
      %368 = vector.multi_reduction <add>, %367, %cst_110 [1] : vector<2x8x4xf32> to vector<2x4xf32>
      %369 = vector.shape_cast %368 : vector<2x4xf32> to vector<2x1x4xf32>
      %370 = vector.broadcast %342 : vector<2x1x1xf32> to vector<2x1x4xf32>
      %371 = arith.mulf %369, %370 : vector<2x1x4xf32>
      %372 = vector.broadcast %354 : vector<2x8x1xf32> to vector<2x8x4xf32>
      %373 = vector.broadcast %371 : vector<2x1x4xf32> to vector<2x8x4xf32>
      %374 = arith.mulf %372, %373 : vector<2x8x4xf32>
      %375 = arith.subf %309, %374 : vector<2x8x4xf32>
      %376 = vector.shape_cast %326 : vector<1x8x1xi1> to vector<1x8x1xi1>
      %377 = vector.broadcast %376 : vector<1x8x1xi1> to vector<2x8x4xi1>
      %378 = vector.shape_cast %371 : vector<2x1x4xf32> to vector<2x1x4xf32>
      %379 = vector.broadcast %378 : vector<2x1x4xf32> to vector<2x8x4xf32>
      %380 = arith.select %377, %379, %375 : vector<2x8x4xi1>, vector<2x8x4xf32>
      %cst_111 = arith.constant 0.000000e+00 : f32
      %381 = vector.shape_cast %326 : vector<1x8x1xi1> to vector<1x8x1xi1>
      %382 = vector.broadcast %381 : vector<1x8x1xi1> to vector<2x8x1xi1>
      %383 = vector.broadcast %cst_111 : f32 to vector<2x8x1xf32>
      %384 = arith.select %382, %324, %383 : vector<2x8x1xi1>, vector<2x8x1xf32>
      %cst_112 = arith.constant dense<0.000000e+00> : vector<2x1xf32>
      %385 = vector.multi_reduction <add>, %384, %cst_112 [1] : vector<2x8x1xf32> to vector<2x1xf32>
      %386 = vector.shape_cast %385 : vector<2x1xf32> to vector<2x1x1xf32>
      %387 = arith.mulf %386, %342 : vector<2x1x1xf32>
      %388 = vector.broadcast %387 : vector<2x1x1xf32> to vector<2x8x1xf32>
      %389 = arith.mulf %354, %388 : vector<2x8x1xf32>
      %390 = arith.subf %324, %389 : vector<2x8x1xf32>
      %391 = vector.shape_cast %326 : vector<1x8x1xi1> to vector<1x8x1xi1>
      %392 = vector.broadcast %391 : vector<1x8x1xi1> to vector<2x8x1xi1>
      %393 = vector.shape_cast %387 : vector<2x1x1xf32> to vector<2x1x1xf32>
      %394 = vector.broadcast %393 : vector<2x1x1xf32> to vector<2x8x1xf32>
      %395 = arith.select %392, %394, %390 : vector<2x8x1xi1>, vector<2x8x1xf32>
      %c5_i32 = arith.constant 5 : i32
      %396 = vector.broadcast %c5_i32 : i32 to vector<1x8x1xi32>
      %397 = arith.cmpi eq, %39, %396 : vector<1x8x1xi32>
      %c5_i32_113 = arith.constant 5 : i32
      %398 = vector.broadcast %c5_i32_113 : i32 to vector<1x1x8xi32>
      %399 = arith.cmpi eq, %40, %398 : vector<1x1x8xi32>
      %cst_114 = arith.constant 0.000000e+00 : f32
      %400 = vector.shape_cast %397 : vector<1x8x1xi1> to vector<1x8x1xi1>
      %401 = vector.broadcast %400 : vector<1x8x1xi1> to vector<2x8x8xi1>
      %402 = vector.broadcast %cst_114 : f32 to vector<2x8x8xf32>
      %403 = arith.select %401, %363, %402 : vector<2x8x8xi1>, vector<2x8x8xf32>
      %cst_115 = arith.constant dense<0.000000e+00> : vector<2x8xf32>
      %404 = vector.multi_reduction <add>, %403, %cst_115 [1] : vector<2x8x8xf32> to vector<2x8xf32>
      %405 = vector.shape_cast %404 : vector<2x8xf32> to vector<2x1x8xf32>
      %cst_116 = arith.constant 0.000000e+00 : f32
      %406 = vector.shape_cast %399 : vector<1x1x8xi1> to vector<1x1x8xi1>
      %407 = vector.broadcast %406 : vector<1x1x8xi1> to vector<2x1x8xi1>
      %408 = vector.broadcast %cst_116 : f32 to vector<2x1x8xf32>
      %409 = arith.select %407, %405, %408 : vector<2x1x8xi1>, vector<2x1x8xf32>
      %cst_117 = arith.constant dense<0.000000e+00> : vector<2x1xf32>
      %410 = vector.multi_reduction <add>, %409, %cst_117 [2] : vector<2x1x8xf32> to vector<2x1xf32>
      %411 = vector.shape_cast %410 : vector<2x1xf32> to vector<2x1x1xf32>
      %cst_118 = arith.constant 1.000000e+00 : f32
      %412 = vector.broadcast %cst_118 : f32 to vector<2x1x1xf32>
      %413 = arith.divf %412, %411 : vector<2x1x1xf32>
      %414 = vector.broadcast %413 : vector<2x1x1xf32> to vector<2x1x8xf32>
      %415 = arith.mulf %405, %414 : vector<2x1x8xf32>
      %cst_119 = arith.constant 0.000000e+00 : f32
      %416 = vector.shape_cast %399 : vector<1x1x8xi1> to vector<1x1x8xi1>
      %417 = vector.broadcast %416 : vector<1x1x8xi1> to vector<2x8x8xi1>
      %418 = vector.broadcast %cst_119 : f32 to vector<2x8x8xf32>
      %419 = arith.select %417, %363, %418 : vector<2x8x8xi1>, vector<2x8x8xf32>
      %cst_120 = arith.constant dense<0.000000e+00> : vector<2x8xf32>
      %420 = vector.multi_reduction <add>, %419, %cst_120 [2] : vector<2x8x8xf32> to vector<2x8xf32>
      %421 = vector.shape_cast %420 : vector<2x8xf32> to vector<2x8x1xf32>
      %cst_121 = arith.constant 0.000000e+00 : f32
      %422 = vector.shape_cast %397 : vector<1x8x1xi1> to vector<1x8x1xi1>
      %423 = vector.broadcast %422 : vector<1x8x1xi1> to vector<2x8x1xi1>
      %424 = vector.broadcast %cst_121 : f32 to vector<2x8x1xf32>
      %425 = arith.select %423, %424, %421 : vector<2x8x1xi1>, vector<2x8x1xf32>
      %426 = vector.broadcast %425 : vector<2x8x1xf32> to vector<2x8x8xf32>
      %427 = vector.broadcast %415 : vector<2x1x8xf32> to vector<2x8x8xf32>
      %428 = arith.mulf %426, %427 : vector<2x8x8xf32>
      %429 = arith.subf %363, %428 : vector<2x8x8xf32>
      %430 = vector.shape_cast %397 : vector<1x8x1xi1> to vector<1x8x1xi1>
      %431 = vector.broadcast %430 : vector<1x8x1xi1> to vector<2x8x8xi1>
      %432 = vector.shape_cast %415 : vector<2x1x8xf32> to vector<2x1x8xf32>
      %433 = vector.broadcast %432 : vector<2x1x8xf32> to vector<2x8x8xf32>
      %434 = arith.select %431, %433, %429 : vector<2x8x8xi1>, vector<2x8x8xf32>
      %cst_122 = arith.constant 0.000000e+00 : f32
      %435 = vector.shape_cast %397 : vector<1x8x1xi1> to vector<1x8x1xi1>
      %436 = vector.broadcast %435 : vector<1x8x1xi1> to vector<2x8x4xi1>
      %437 = vector.broadcast %cst_122 : f32 to vector<2x8x4xf32>
      %438 = arith.select %436, %380, %437 : vector<2x8x4xi1>, vector<2x8x4xf32>
      %cst_123 = arith.constant dense<0.000000e+00> : vector<2x4xf32>
      %439 = vector.multi_reduction <add>, %438, %cst_123 [1] : vector<2x8x4xf32> to vector<2x4xf32>
      %440 = vector.shape_cast %439 : vector<2x4xf32> to vector<2x1x4xf32>
      %441 = vector.broadcast %413 : vector<2x1x1xf32> to vector<2x1x4xf32>
      %442 = arith.mulf %440, %441 : vector<2x1x4xf32>
      %443 = vector.broadcast %425 : vector<2x8x1xf32> to vector<2x8x4xf32>
      %444 = vector.broadcast %442 : vector<2x1x4xf32> to vector<2x8x4xf32>
      %445 = arith.mulf %443, %444 : vector<2x8x4xf32>
      %446 = arith.subf %380, %445 : vector<2x8x4xf32>
      %447 = vector.shape_cast %397 : vector<1x8x1xi1> to vector<1x8x1xi1>
      %448 = vector.broadcast %447 : vector<1x8x1xi1> to vector<2x8x4xi1>
      %449 = vector.shape_cast %442 : vector<2x1x4xf32> to vector<2x1x4xf32>
      %450 = vector.broadcast %449 : vector<2x1x4xf32> to vector<2x8x4xf32>
      %451 = arith.select %448, %450, %446 : vector<2x8x4xi1>, vector<2x8x4xf32>
      %cst_124 = arith.constant 0.000000e+00 : f32
      %452 = vector.shape_cast %397 : vector<1x8x1xi1> to vector<1x8x1xi1>
      %453 = vector.broadcast %452 : vector<1x8x1xi1> to vector<2x8x1xi1>
      %454 = vector.broadcast %cst_124 : f32 to vector<2x8x1xf32>
      %455 = arith.select %453, %395, %454 : vector<2x8x1xi1>, vector<2x8x1xf32>
      %cst_125 = arith.constant dense<0.000000e+00> : vector<2x1xf32>
      %456 = vector.multi_reduction <add>, %455, %cst_125 [1] : vector<2x8x1xf32> to vector<2x1xf32>
      %457 = vector.shape_cast %456 : vector<2x1xf32> to vector<2x1x1xf32>
      %458 = arith.mulf %457, %413 : vector<2x1x1xf32>
      %459 = vector.broadcast %458 : vector<2x1x1xf32> to vector<2x8x1xf32>
      %460 = arith.mulf %425, %459 : vector<2x8x1xf32>
      %461 = arith.subf %395, %460 : vector<2x8x1xf32>
      %462 = vector.shape_cast %397 : vector<1x8x1xi1> to vector<1x8x1xi1>
      %463 = vector.broadcast %462 : vector<1x8x1xi1> to vector<2x8x1xi1>
      %464 = vector.shape_cast %458 : vector<2x1x1xf32> to vector<2x1x1xf32>
      %465 = vector.broadcast %464 : vector<2x1x1xf32> to vector<2x8x1xf32>
      %466 = arith.select %463, %465, %461 : vector<2x8x1xi1>, vector<2x8x1xf32>
      %c6_i32 = arith.constant 6 : i32
      %467 = vector.broadcast %c6_i32 : i32 to vector<1x8x1xi32>
      %468 = arith.cmpi eq, %39, %467 : vector<1x8x1xi32>
      %c6_i32_126 = arith.constant 6 : i32
      %469 = vector.broadcast %c6_i32_126 : i32 to vector<1x1x8xi32>
      %470 = arith.cmpi eq, %40, %469 : vector<1x1x8xi32>
      %cst_127 = arith.constant 0.000000e+00 : f32
      %471 = vector.shape_cast %468 : vector<1x8x1xi1> to vector<1x8x1xi1>
      %472 = vector.broadcast %471 : vector<1x8x1xi1> to vector<2x8x8xi1>
      %473 = vector.broadcast %cst_127 : f32 to vector<2x8x8xf32>
      %474 = arith.select %472, %434, %473 : vector<2x8x8xi1>, vector<2x8x8xf32>
      %cst_128 = arith.constant dense<0.000000e+00> : vector<2x8xf32>
      %475 = vector.multi_reduction <add>, %474, %cst_128 [1] : vector<2x8x8xf32> to vector<2x8xf32>
      %476 = vector.shape_cast %475 : vector<2x8xf32> to vector<2x1x8xf32>
      %cst_129 = arith.constant 0.000000e+00 : f32
      %477 = vector.shape_cast %470 : vector<1x1x8xi1> to vector<1x1x8xi1>
      %478 = vector.broadcast %477 : vector<1x1x8xi1> to vector<2x1x8xi1>
      %479 = vector.broadcast %cst_129 : f32 to vector<2x1x8xf32>
      %480 = arith.select %478, %476, %479 : vector<2x1x8xi1>, vector<2x1x8xf32>
      %cst_130 = arith.constant dense<0.000000e+00> : vector<2x1xf32>
      %481 = vector.multi_reduction <add>, %480, %cst_130 [2] : vector<2x1x8xf32> to vector<2x1xf32>
      %482 = vector.shape_cast %481 : vector<2x1xf32> to vector<2x1x1xf32>
      %cst_131 = arith.constant 1.000000e+00 : f32
      %483 = vector.broadcast %cst_131 : f32 to vector<2x1x1xf32>
      %484 = arith.divf %483, %482 : vector<2x1x1xf32>
      %485 = vector.broadcast %484 : vector<2x1x1xf32> to vector<2x1x8xf32>
      %486 = arith.mulf %476, %485 : vector<2x1x8xf32>
      %cst_132 = arith.constant 0.000000e+00 : f32
      %487 = vector.shape_cast %470 : vector<1x1x8xi1> to vector<1x1x8xi1>
      %488 = vector.broadcast %487 : vector<1x1x8xi1> to vector<2x8x8xi1>
      %489 = vector.broadcast %cst_132 : f32 to vector<2x8x8xf32>
      %490 = arith.select %488, %434, %489 : vector<2x8x8xi1>, vector<2x8x8xf32>
      %cst_133 = arith.constant dense<0.000000e+00> : vector<2x8xf32>
      %491 = vector.multi_reduction <add>, %490, %cst_133 [2] : vector<2x8x8xf32> to vector<2x8xf32>
      %492 = vector.shape_cast %491 : vector<2x8xf32> to vector<2x8x1xf32>
      %cst_134 = arith.constant 0.000000e+00 : f32
      %493 = vector.shape_cast %468 : vector<1x8x1xi1> to vector<1x8x1xi1>
      %494 = vector.broadcast %493 : vector<1x8x1xi1> to vector<2x8x1xi1>
      %495 = vector.broadcast %cst_134 : f32 to vector<2x8x1xf32>
      %496 = arith.select %494, %495, %492 : vector<2x8x1xi1>, vector<2x8x1xf32>
      %497 = vector.broadcast %496 : vector<2x8x1xf32> to vector<2x8x8xf32>
      %498 = vector.broadcast %486 : vector<2x1x8xf32> to vector<2x8x8xf32>
      %499 = arith.mulf %497, %498 : vector<2x8x8xf32>
      %500 = arith.subf %434, %499 : vector<2x8x8xf32>
      %501 = vector.shape_cast %468 : vector<1x8x1xi1> to vector<1x8x1xi1>
      %502 = vector.broadcast %501 : vector<1x8x1xi1> to vector<2x8x8xi1>
      %503 = vector.shape_cast %486 : vector<2x1x8xf32> to vector<2x1x8xf32>
      %504 = vector.broadcast %503 : vector<2x1x8xf32> to vector<2x8x8xf32>
      %505 = arith.select %502, %504, %500 : vector<2x8x8xi1>, vector<2x8x8xf32>
      %cst_135 = arith.constant 0.000000e+00 : f32
      %506 = vector.shape_cast %468 : vector<1x8x1xi1> to vector<1x8x1xi1>
      %507 = vector.broadcast %506 : vector<1x8x1xi1> to vector<2x8x4xi1>
      %508 = vector.broadcast %cst_135 : f32 to vector<2x8x4xf32>
      %509 = arith.select %507, %451, %508 : vector<2x8x4xi1>, vector<2x8x4xf32>
      %cst_136 = arith.constant dense<0.000000e+00> : vector<2x4xf32>
      %510 = vector.multi_reduction <add>, %509, %cst_136 [1] : vector<2x8x4xf32> to vector<2x4xf32>
      %511 = vector.shape_cast %510 : vector<2x4xf32> to vector<2x1x4xf32>
      %512 = vector.broadcast %484 : vector<2x1x1xf32> to vector<2x1x4xf32>
      %513 = arith.mulf %511, %512 : vector<2x1x4xf32>
      %514 = vector.broadcast %496 : vector<2x8x1xf32> to vector<2x8x4xf32>
      %515 = vector.broadcast %513 : vector<2x1x4xf32> to vector<2x8x4xf32>
      %516 = arith.mulf %514, %515 : vector<2x8x4xf32>
      %517 = arith.subf %451, %516 : vector<2x8x4xf32>
      %518 = vector.shape_cast %468 : vector<1x8x1xi1> to vector<1x8x1xi1>
      %519 = vector.broadcast %518 : vector<1x8x1xi1> to vector<2x8x4xi1>
      %520 = vector.shape_cast %513 : vector<2x1x4xf32> to vector<2x1x4xf32>
      %521 = vector.broadcast %520 : vector<2x1x4xf32> to vector<2x8x4xf32>
      %522 = arith.select %519, %521, %517 : vector<2x8x4xi1>, vector<2x8x4xf32>
      %cst_137 = arith.constant 0.000000e+00 : f32
      %523 = vector.shape_cast %468 : vector<1x8x1xi1> to vector<1x8x1xi1>
      %524 = vector.broadcast %523 : vector<1x8x1xi1> to vector<2x8x1xi1>
      %525 = vector.broadcast %cst_137 : f32 to vector<2x8x1xf32>
      %526 = arith.select %524, %466, %525 : vector<2x8x1xi1>, vector<2x8x1xf32>
      %cst_138 = arith.constant dense<0.000000e+00> : vector<2x1xf32>
      %527 = vector.multi_reduction <add>, %526, %cst_138 [1] : vector<2x8x1xf32> to vector<2x1xf32>
      %528 = vector.shape_cast %527 : vector<2x1xf32> to vector<2x1x1xf32>
      %529 = arith.mulf %528, %484 : vector<2x1x1xf32>
      %530 = vector.broadcast %529 : vector<2x1x1xf32> to vector<2x8x1xf32>
      %531 = arith.mulf %496, %530 : vector<2x8x1xf32>
      %532 = arith.subf %466, %531 : vector<2x8x1xf32>
      %533 = vector.shape_cast %468 : vector<1x8x1xi1> to vector<1x8x1xi1>
      %534 = vector.broadcast %533 : vector<1x8x1xi1> to vector<2x8x1xi1>
      %535 = vector.shape_cast %529 : vector<2x1x1xf32> to vector<2x1x1xf32>
      %536 = vector.broadcast %535 : vector<2x1x1xf32> to vector<2x8x1xf32>
      %537 = arith.select %534, %536, %532 : vector<2x8x1xi1>, vector<2x8x1xf32>
      %c7_i32 = arith.constant 7 : i32
      %538 = vector.broadcast %c7_i32 : i32 to vector<1x8x1xi32>
      %539 = arith.cmpi eq, %39, %538 : vector<1x8x1xi32>
      %c7_i32_139 = arith.constant 7 : i32
      %540 = vector.broadcast %c7_i32_139 : i32 to vector<1x1x8xi32>
      %541 = arith.cmpi eq, %40, %540 : vector<1x1x8xi32>
      %cst_140 = arith.constant 0.000000e+00 : f32
      %542 = vector.shape_cast %539 : vector<1x8x1xi1> to vector<1x8x1xi1>
      %543 = vector.broadcast %542 : vector<1x8x1xi1> to vector<2x8x8xi1>
      %544 = vector.broadcast %cst_140 : f32 to vector<2x8x8xf32>
      %545 = arith.select %543, %505, %544 : vector<2x8x8xi1>, vector<2x8x8xf32>
      %cst_141 = arith.constant dense<0.000000e+00> : vector<2x8xf32>
      %546 = vector.multi_reduction <add>, %545, %cst_141 [1] : vector<2x8x8xf32> to vector<2x8xf32>
      %547 = vector.shape_cast %546 : vector<2x8xf32> to vector<2x1x8xf32>
      %cst_142 = arith.constant 0.000000e+00 : f32
      %548 = vector.shape_cast %541 : vector<1x1x8xi1> to vector<1x1x8xi1>
      %549 = vector.broadcast %548 : vector<1x1x8xi1> to vector<2x1x8xi1>
      %550 = vector.broadcast %cst_142 : f32 to vector<2x1x8xf32>
      %551 = arith.select %549, %547, %550 : vector<2x1x8xi1>, vector<2x1x8xf32>
      %cst_143 = arith.constant dense<0.000000e+00> : vector<2x1xf32>
      %552 = vector.multi_reduction <add>, %551, %cst_143 [2] : vector<2x1x8xf32> to vector<2x1xf32>
      %553 = vector.shape_cast %552 : vector<2x1xf32> to vector<2x1x1xf32>
      %cst_144 = arith.constant 1.000000e+00 : f32
      %554 = vector.broadcast %cst_144 : f32 to vector<2x1x1xf32>
      %555 = arith.divf %554, %553 : vector<2x1x1xf32>
      %cst_145 = arith.constant 0.000000e+00 : f32
      %556 = vector.shape_cast %541 : vector<1x1x8xi1> to vector<1x1x8xi1>
      %557 = vector.broadcast %556 : vector<1x1x8xi1> to vector<2x8x8xi1>
      %558 = vector.broadcast %cst_145 : f32 to vector<2x8x8xf32>
      %559 = arith.select %557, %505, %558 : vector<2x8x8xi1>, vector<2x8x8xf32>
      %cst_146 = arith.constant dense<0.000000e+00> : vector<2x8xf32>
      %560 = vector.multi_reduction <add>, %559, %cst_146 [2] : vector<2x8x8xf32> to vector<2x8xf32>
      %561 = vector.shape_cast %560 : vector<2x8xf32> to vector<2x8x1xf32>
      %cst_147 = arith.constant 0.000000e+00 : f32
      %562 = vector.shape_cast %539 : vector<1x8x1xi1> to vector<1x8x1xi1>
      %563 = vector.broadcast %562 : vector<1x8x1xi1> to vector<2x8x1xi1>
      %564 = vector.broadcast %cst_147 : f32 to vector<2x8x1xf32>
      %565 = arith.select %563, %564, %561 : vector<2x8x1xi1>, vector<2x8x1xf32>
      %cst_148 = arith.constant 0.000000e+00 : f32
      %566 = vector.shape_cast %539 : vector<1x8x1xi1> to vector<1x8x1xi1>
      %567 = vector.broadcast %566 : vector<1x8x1xi1> to vector<2x8x4xi1>
      %568 = vector.broadcast %cst_148 : f32 to vector<2x8x4xf32>
      %569 = arith.select %567, %522, %568 : vector<2x8x4xi1>, vector<2x8x4xf32>
      %cst_149 = arith.constant dense<0.000000e+00> : vector<2x4xf32>
      %570 = vector.multi_reduction <add>, %569, %cst_149 [1] : vector<2x8x4xf32> to vector<2x4xf32>
      %571 = vector.shape_cast %570 : vector<2x4xf32> to vector<2x1x4xf32>
      %572 = vector.broadcast %555 : vector<2x1x1xf32> to vector<2x1x4xf32>
      %573 = arith.mulf %571, %572 : vector<2x1x4xf32>
      %574 = vector.broadcast %565 : vector<2x8x1xf32> to vector<2x8x4xf32>
      %575 = vector.broadcast %573 : vector<2x1x4xf32> to vector<2x8x4xf32>
      %576 = arith.mulf %574, %575 : vector<2x8x4xf32>
      %577 = arith.subf %522, %576 : vector<2x8x4xf32>
      %578 = vector.shape_cast %539 : vector<1x8x1xi1> to vector<1x8x1xi1>
      %579 = vector.broadcast %578 : vector<1x8x1xi1> to vector<2x8x4xi1>
      %580 = vector.shape_cast %573 : vector<2x1x4xf32> to vector<2x1x4xf32>
      %581 = vector.broadcast %580 : vector<2x1x4xf32> to vector<2x8x4xf32>
      %582 = arith.select %579, %581, %577 : vector<2x8x4xi1>, vector<2x8x4xf32>
      %cst_150 = arith.constant 0.000000e+00 : f32
      %583 = vector.shape_cast %539 : vector<1x8x1xi1> to vector<1x8x1xi1>
      %584 = vector.broadcast %583 : vector<1x8x1xi1> to vector<2x8x1xi1>
      %585 = vector.broadcast %cst_150 : f32 to vector<2x8x1xf32>
      %586 = arith.select %584, %537, %585 : vector<2x8x1xi1>, vector<2x8x1xf32>
      %cst_151 = arith.constant dense<0.000000e+00> : vector<2x1xf32>
      %587 = vector.multi_reduction <add>, %586, %cst_151 [1] : vector<2x8x1xf32> to vector<2x1xf32>
      %588 = vector.shape_cast %587 : vector<2x1xf32> to vector<2x1x1xf32>
      %589 = arith.mulf %588, %555 : vector<2x1x1xf32>
      %590 = vector.broadcast %589 : vector<2x1x1xf32> to vector<2x8x1xf32>
      %591 = arith.mulf %565, %590 : vector<2x8x1xf32>
      %592 = arith.subf %537, %591 : vector<2x8x1xf32>
      %593 = vector.shape_cast %539 : vector<1x8x1xi1> to vector<1x8x1xi1>
      %594 = vector.broadcast %593 : vector<1x8x1xi1> to vector<2x8x1xi1>
      %595 = vector.shape_cast %589 : vector<2x1x1xf32> to vector<2x1x1xf32>
      %596 = vector.broadcast %595 : vector<2x1x1xf32> to vector<2x8x1xf32>
      %597 = arith.select %594, %596, %592 : vector<2x8x1xi1>, vector<2x8x1xf32>
      %598 = vector.broadcast %37 : vector<2x8x1xf32> to vector<2x8x4xf32>
      %599 = arith.mulf %598, %582 : vector<2x8x4xf32>
      %cst_152 = arith.constant dense<0.000000e+00> : vector<2x4xf32>
      %600 = vector.multi_reduction <add>, %599, %cst_152 [1] : vector<2x8x4xf32> to vector<2x4xf32>
      %601 = vector.shape_cast %600 : vector<2x4xf32> to vector<2x1x4xf32>
      %602 = arith.mulf %37, %597 : vector<2x8x1xf32>
      %cst_153 = arith.constant dense<0.000000e+00> : vector<2x1xf32>
      %603 = vector.multi_reduction <add>, %602, %cst_153 [1] : vector<2x8x1xf32> to vector<2x1xf32>
      %604 = vector.shape_cast %603 : vector<2x1xf32> to vector<2x1x1xf32>
      %cst_154 = arith.constant 1.600000e+01 : f32
      %605 = arith.addf %cst_154, %26 : f32
      %606 = vector.broadcast %605 : f32 to vector<2x1x1xf32>
      %607 = arith.subf %606, %604 : vector<2x1x1xf32>
      %c0_155 = arith.constant 0 : index
      %c0_156 = arith.constant 0 : index
      %c0_157 = arith.constant 0 : index
      %608 = vector.load %arg9[%c0_155, %c0_156, %c0_157] : memref<2x1x4xf32, #tpu.memory_space<vmem>>, vector<2x1x4xf32>
      %609 = arith.subf %608, %601 : vector<2x1x4xf32>
      %610 = vector.broadcast %607 : vector<2x1x1xf32> to vector<2x1x4xf32>
      %611 = arith.divf %609, %610 : vector<2x1x4xf32>
      %612 = vector.broadcast %597 : vector<2x8x1xf32> to vector<2x8x4xf32>
      %613 = vector.broadcast %611 : vector<2x1x4xf32> to vector<2x8x4xf32>
      %614 = arith.mulf %612, %613 : vector<2x8x4xf32>
      %615 = arith.subf %582, %614 : vector<2x8x4xf32>
      %c0_158 = arith.constant 0 : index
      %c0_159 = arith.constant 0 : index
      %c0_160 = arith.constant 0 : index
      %616 = vector.load %arg5[%c0_158, %c0_159, %c0_160] : memref<2x9x4xf32, #tpu.memory_space<vmem>>, vector<2x8x4xf32>
      tpu.vector_store %arg5[%c0_158, %c0_159, %c0_160], %615 {strides = array<i32>} : memref<2x9x4xf32, #tpu.memory_space<vmem>>, vector<2x8x4xf32>,
      %c0_161 = arith.constant 0 : index
      %c8 = arith.constant 8 : index
      %c0_162 = arith.constant 0 : index
      %617 = vector.load %arg5[%c0_161, %c8, %c0_162] : memref<2x9x4xf32, #tpu.memory_space<vmem>>, vector<2x1x4xf32>
      tpu.vector_store %arg5[%c0_161, %c8, %c0_162], %611 {strides = array<i32>} : memref<2x9x4xf32, #tpu.memory_space<vmem>>, vector<2x1x4xf32>,
    } else {
    }
    return
  }
  func.func @transform_0(%arg0: i32, %arg1: i32) -> (i32, i32) {
    %c0_i32 = arith.constant 0 : i32
    %c0_i32_0 = arith.constant 0 : i32
    %c0_i32_1 = arith.constant 0 : i32
    return %c0_i32, %c0_i32_0 : i32, i32
  }
  func.func @transform_1(%arg0: i32, %arg1: i32) -> (i32, i32, i32) {
    %c0_i32 = arith.constant 0 : i32
    %c0_i32_0 = arith.constant 0 : i32
    return %arg0, %arg1, %c0_i32 : i32, i32, i32
  }
  func.func @transform_2(%arg0: i32, %arg1: i32) -> (i32, i32, i32) {
    %c0_i32 = arith.constant 0 : i32
    %c0_i32_0 = arith.constant 0 : i32
    return %arg0, %arg1, %c0_i32 : i32, i32, i32
  }
  func.func @transform_3(%arg0: i32, %arg1: i32) -> (i32, i32, i32) {
    %c0_i32 = arith.constant 0 : i32
    %c0_i32_0 = arith.constant 0 : i32
    %c0_i32_1 = arith.constant 0 : i32
    return %arg0, %c0_i32, %c0_i32_0 : i32, i32, i32
  }
}

</mosaic_0001>

<bundles_post_ra>
// kernel: tpu_custom_call.1
= control target key start
LH: loop header
LB: loop body
LE: loop exit
PB: predicated region body
PF: predicated region fallthrough
CT: control target
= control target key end

     0   :  { %vm22_vm0 = vcmask 31744   ;;  %vm28_vm1 = vcmask 24576   ;;  %v1466_v3 = vmov 0.0   ;;  %v1467_v22 = vmov 1.0   ;;  %s2190_s1 = inlined_call_operand.vmem [shape: f32[2,16,8], index: 1, kind: input, shape index: {}]   ;;  %s2191_s2 = inlined_call_operand.vmem [shape: f32[2,16,4], index: 2, kind: input, shape index: {}]   ;;  %s2192_s0 = inlined_call_operand.<no memory space> [shape: f32[1,1], index: 0, kind: input, shape index: {}]   ;;  %s2193_s3 = inlined_call_operand.vmem [shape: f32[2,9,4], index: 3, kind: output, shape index: {}]  }
   0x1   :  { %v33_v0 = vld [vmem:[%s2190_s1 + $0x10] sm:$0xff]  ;;  %v31_v1 = vld [vmem:[%s2190_s1] sm:$0xff]  ;;  %v34_v2 = vld [vmem:[%s2190_s1 + $0x18] sm:$0xff]  ;;  %29 = vst.msk [vmem:[#allocation5] sm:$0x1] %vm28_vm1, %v1466_v3  ;;  %vm19_vm2 = vcmask 64512   ;;  %v282_v34 = vlaneseq  ;;  %v289_v44 = vstv %s2192_s0 }
   0x2   :  { %97 = vxpose.xlu1.b32.start [1/2] (short) (narrow) %v33_v0, 8  ;;  %41 = vxpose.xlu0.b32.start [1/2] (short) (narrow) %v31_v1, 8  ;;  %v32_v4 = vld [vmem:[%s2190_s1 + $0x8] sm:$0xff]  ;;  %v35_v6 = vld [vmem:[%s2191_s2] sm:$0xff]  ;;  %23 = vst.msk [vmem:[#allocation3] sm:$0xff] %vm22_vm0, %v1466_v3  ;;  %v38_v18 = vld [vmem:[%s2191_s2 + $0x18] sm:$0xff] }
   0x3   :  { %v36_v5 = vld [vmem:[%s2191_s2 + $0x8] sm:$0xff]  ;;  %91 = vmatpush.msra.mxu0 %v32_v4  ;;  %146 = vmatpush.msra.mxu1 %v34_v2  ;;  %v253_v8 = vsel %vm22_vm0, %v35_v6, 0.0  ;;  %24 = vst.msk [vmem:[#allocation3 + $0x8] sm:$0xff] %vm22_vm0, %v1466_v3  ;;  %v37_v19 = vld [vmem:[%s2191_s2 + $0x10] sm:$0xff]  ;;  %v263_v20 = vsel %vm22_vm0, %v38_v18, 0.0  ;;  %vm73_vm3 = vcmask 130048  }
   0x4   :  { %v254_v7 = vsel %vm22_vm0, %v36_v5, 0.0  ;;  %173 = vmatpush.msra.mxu2 %v36_v5  ;;  %30 = vst.msk [vmem:[#allocation5 + $0x1] sm:$0x1] %vm28_vm1, %v1466_v3  ;;  %193 = vmatpush.msra.mxu3 %v38_v18  ;;  %v262_v21 = vsel %vm22_vm0, %v37_v19, 0.0  ;;  %vm25_vm4 = vcmask 7168   ;;  %v1535_v35 = vshrl.u32 %v282_v34, 7 }
   0x5   :  { %v255_v9 = vadd.f32 %v254_v7, %v253_v8  ;;  %147 = vmatpush.msra.mxu1 %v33_v0  ;;  %92 = vmatpush.msra.mxu0 %v31_v1  ;;  %v264_v23 = vadd.f32 %v263_v20, %v262_v21  ;;  %20 = vst.msk [vmem:[#allocation2] sm:$0xff] %vm19_vm2, %v1466_v3  ;;  %v1537_v36 = vand.u32 127, %v282_v34  ;;  %s1339_s30 = sadd.f32 16.0, %s2192_s0 }
   0x6   :  { %174 = vmatpush.msra.mxu2 %v35_v6  ;;  %194 = vmatpush.msra.mxu3 %v37_v19  ;;  %21 = vst.msk [vmem:[#allocation2 + $0x8] sm:$0xff] %vm19_vm2, %v1466_v3  ;;  %vm297_vm7 = vcmp.eq.s32.totalorder %v1535_v35, 0  ;;  %vm423_vm14 = vcmp.eq.s32.totalorder %v1535_v35, 1 }
   0x7   :  { %v256_v10 = vrot.slane %v255_v9, 4  ;;  %220 = vmatpush.msrb.mxu0 %v1467_v22  ;;  %240 = vmatpush.msrb.mxu1 %v1467_v22  ;;  %v265_v24 = vrot.slane %v264_v23, 4  ;;  %26 = vst.msk [vmem:[#allocation4] sm:$0xff] %vm25_vm4, %v1466_v3  ;;  %vm286_vm5 = vcmp.eq.s32.totalorder %v1535_v35, %v1537_v36  ;;  %vm298_vm6 = vcmp.eq.s32.totalorder %v1537_v36, 0 }
   0x8   :  { %v251_v15 = vld [vmem:[#allocation5] sm:$0x1]  ;;  %27 = vst.msk [vmem:[#allocation4 + $0x8] sm:$0xff] %vm25_vm4, %v1466_v3  ;;  %v1421_v43 = vsel %vm286_vm5, 1.0, %v1466_v3  ;;  %vm424_vm5 = vcmp.eq.s32.totalorder %v1537_v36, 1 }
   0x9   :  { %v257_v11 = vadd.f32 %v256_v10, %v255_v9  ;;  %221 = vmatpush.msrb.mxu0 %v1467_v22  ;;  %241 = vmatpush.msrb.mxu1 %v1467_v22  ;;  %v266_v25 = vadd.f32 %v265_v24, %v264_v23  ;;  %v157_v45 = vld [vmem:[#allocation3] sm:$0xff]  ;;  %v290_v51 = vmul.f32 %v1421_v43, %v289_v44 }
   0xa   :  { %98 = vxpose.xlu1.b32.end [2/2] (short) (narrow) %v34_v2, 8  ;;  %42 = vxpose.xlu0.b32.end [2/2] (short) (narrow) %v32_v4, 8  ;;  %v158_v48 = vld [vmem:[#allocation3 + $0x8] sm:$0xff] }
   0xb   :  { %v258_v12 = vrot.slane %v257_v11, 2  ;;  %v267_v26 = vrot.slane %v266_v25, 2  ;;  %v252_v29 = vld [vmem:[#allocation5 + $0x1] sm:$0x1] }
   0xc   :  { %v39_v37 = vld [vmem:[#allocation2] sm:$0xff] }
   0xd   :  { %v259_v13 = vadd.f32 %v258_v12, %v257_v11  ;;  %v268_v27 = vadd.f32 %v267_v26, %v266_v25  ;;  %v40_v38 = vld [vmem:[#allocation2 + $0x8] sm:$0xff] }
   0xe   :  { %v204_v46 = vld [vmem:[#allocation4] sm:$0xff] }
   0xf   :  { %v260_v14 = vrot.slane %v259_v13, 1  ;;  %v269_v28 = vrot.slane %v268_v27, 1  ;;  %v205_v47 = vld [vmem:[#allocation4 + $0x8] sm:$0xff] }
  0x11   :  { %v261_v16 = vadd.f32 %v260_v14, %v259_v13  ;;  %v270_v30 = vadd.f32 %v269_v28, %v268_v27 }
  0x13   :  { %v271_v17 = vadd.f32 %v261_v16, %v251_v15  ;;  %v272_v31 = vadd.f32 %v270_v30, %v252_v29 }
  0x15   :  { %274 = vst.msk [vmem:[#allocation5] sm:$0x1] %vm28_vm1, %v271_v17 }
  0x16   :  { %275 = vst.msk [vmem:[#allocation5 + $0x1] sm:$0x1] %vm28_vm1, %v272_v31 }
  0xa6   :  { %v113_v32 = vpop.trf.xlu1  ;;  %v57_v33 = vpop.trf.xlu0 }
  0xa7   :  { %1415 = vmatmul.msk.f32.vlgmr.msra.gmra.mxu0 %vm73_vm3, %v57_v33  ;;  %1416 = vmatmul.msk.f32.vlgmr.msra.gmra.mxu1 %vm73_vm3, %v113_v32 }
  0xa8   :  { %1417 = vmatmul.msk.f32.vlgmr.msra.gmra.mxu2 %vm73_vm3, %v57_v33  ;;  %1418 = vmatmul.msk.f32.vlgmr.msra.gmra.mxu3 %vm73_vm3, %v113_v32 }
  0xaf   :  { %1419 = vmatmul.msk.f32.vlgmr.msrb.gmra.mxu0 %vm73_vm3, %v57_v33  ;;  %1420 = vmatmul.msk.f32.vlgmr.msrb.gmra.mxu1 %vm73_vm3, %v113_v32 }
 0x124   :  { %v94_v39 = vpop.f32.mrf.mxu0  ;;  %v149_v40 = vpop.f32.mrf.mxu1 }
 0x125   :  { %v152_v41 = vadd.f32 %v94_v39, %v39_v37  ;;  %v153_v42 = vadd.f32 %v149_v40, %v40_v38 }
 0x127   :  { %155 = vst.msk [vmem:[#allocation2] sm:$0xff] %vm19_vm2, %v152_v41 }
 0x128   :  { %156 = vst.msk [vmem:[#allocation2 + $0x8] sm:$0xff] %vm19_vm2, %v153_v42 }
 0x12b   :  { %v176_v49 = vpop.f32.mrf.mxu2  ;;  %v196_v50 = vpop.f32.mrf.mxu3 }
 0x12c   :  { %v199_v52 = vadd.f32 %v176_v49, %v157_v45  ;;  %v223_v53 = vpop.f32.mrf.mxu0  ;;  %v243_v54 = vpop.f32.mrf.mxu1  ;;  %v200_v57 = vadd.f32 %v196_v50, %v158_v48 }
 0x12d   :  { %v246_v55 = vadd.f32 %v223_v53, %v204_v46  ;;  %v247_v56 = vadd.f32 %v243_v54, %v205_v47 }
 0x12e   :  { %202 = vst.msk [vmem:[#allocation3] sm:$0xff] %vm22_vm0, %v199_v52  ;;  %v280_v58 = vld [vmem:[#allocation2] sm:$0xff] }
 0x12f   :  { %249 = vst.msk [vmem:[#allocation4] sm:$0xff] %vm25_vm4, %v246_v55  ;;  %v1551_v59 = vadd.f32 %v290_v51, %v280_v58  ;;  %v281_v60 = vld [vmem:[#allocation2 + $0x8] sm:$0xff] }
 0x130   :  { %250 = vst.msk [vmem:[#allocation4 + $0x8] sm:$0xff] %vm25_vm4, %v247_v56  ;;  %v1554_v61 = vadd.f32 %v290_v51, %v281_v60 }
 0x131   :  { %203 = vst.msk [vmem:[#allocation3 + $0x8] sm:$0xff] %vm22_vm0, %v200_v57  ;;  %v359_v62 = vsel %vm298_vm6, %v1551_v59, 0.0  ;;  %v301_v63 = vsel %vm297_vm7, %v1551_v59, 0.0 }
 0x132   :  { %v361_v0 = vsel %vm19_vm2, %v359_v62, 0.0  ;;  %v360_v1 = vsel %vm298_vm6, %v1554_v61, 0.0  ;;  %v303_v2 = vsel %vm19_vm2, %v301_v63, 0.0  ;;  %v302_v3 = vsel %vm297_vm7, %v1554_v61, 0.0 }
 0x133   :  { %362 = vadd.xlane.f32.xlu0 %v361_v0  ;;  %v364_v4 = vsel %vm19_vm2, %v360_v1, 0.0  ;;  %v304_v5 = vrot.slane %v303_v2, 4  ;;  %v310_v6 = vsel %vm19_vm2, %v302_v3, 0.0 }
 0x134   :  { %365 = vadd.xlane.f32.xlu1 %v364_v4  ;;  %v311_v7 = vrot.slane %v310_v6, 4 }
 0x135   :  { %v305_v8 = vadd.f32 %v304_v5, %v303_v2  ;;  %v1582_v22 = vld [vmem:[#allocation3] sm:$0xff] }
 0x136   :  { %v312_v9 = vadd.f32 %v311_v7, %v310_v6  ;;  %v1584_v23 = vld [vmem:[#allocation4] sm:$0xff]  ;;  %v375_v24 = vsel %vm297_vm7, %v1582_v22, 0.0 }
 0x137   :  { %v306_v10 = vrot.slane %v305_v8, 2  ;;  %v399_v25 = vsel %vm297_vm7, %v1584_v23, 0.0  ;;  %v377_v26 = vsel %vm22_vm0, %v375_v24, 0.0  ;;  %v1594_v30 = vld [vmem:[#allocation4 + $0x8] sm:$0xff] }
 0x138   :  { %v313_v11 = vrot.slane %v312_v9, 2  ;;  %v401_v27 = vsel %vm25_vm4, %v399_v25, 0.0  ;;  %v378_v28 = vrot.slane %v377_v26, 4  ;;  %v1596_v31 = vld [vmem:[#allocation3 + $0x8] sm:$0xff]  ;;  %v400_v34 = vsel %vm297_vm7, %v1594_v30, 0.0 }
 0x139   :  { %v307_v12 = vadd.f32 %v306_v10, %v305_v8  ;;  %v402_v29 = vrot.slane %v401_v27, 4  ;;  %v376_v33 = vsel %vm297_vm7, %v1596_v31, 0.0  ;;  %v408_v40 = vsel %vm25_vm4, %v400_v34, 0.0 }
 0x13a   :  { %v314_v13 = vadd.f32 %v313_v11, %v312_v9  ;;  %v379_v32 = vadd.f32 %v378_v28, %v377_v26  ;;  %v384_v39 = vsel %vm22_vm0, %v376_v33, 0.0  ;;  %v409_v44 = vrot.slane %v408_v40, 4 }
 0x13b   :  { %v308_v14 = vrot.slane %v307_v12, 1  ;;  %v403_v38 = vadd.f32 %v402_v29, %v401_v27  ;;  %v385_v43 = vrot.slane %v384_v39, 4 }
 0x13c   :  { %v315_v16 = vrot.slane %v314_v13, 1  ;;  %v380_v41 = vrot.slane %v379_v32, 2  ;;  %v410_v51 = vadd.f32 %v409_v44, %v408_v40 }
 0x13d   :  { %v309_v15 = vadd.f32 %v308_v14, %v307_v12  ;;  %v404_v42 = vrot.slane %v403_v38, 2  ;;  %v386_v50 = vadd.f32 %v385_v43, %v384_v39 }
 0x13e   :  { %v1576_v19 = vadd.f32 %v315_v16, %v314_v13  ;;  %v381_v46 = vadd.f32 %v380_v41, %v379_v32  ;;  %v411_v60 = vrot.slane %v410_v51, 2 }
 0x13f   :  { %v319_v17 = vsel %vm298_vm6, %v309_v15, 0.0  ;;  %v405_v49 = vadd.f32 %v404_v42, %v403_v38  ;;  %v387_v58 = vrot.slane %v386_v50, 2 }
 0x140   :  { %v321_v18 = vsel %vm19_vm2, %v319_v17, 0.0  ;;  %v320_v20 = vsel %vm298_vm6, %v1576_v19, 0.0  ;;  %v382_v54 = vrot.slane %v381_v46, 1  ;;  %v412_v8 = vadd.f32 %v411_v60, %v410_v51 }
 0x141   :  { %322 = vadd.xlane.f32.xlu2 %v321_v18  ;;  %v324_v21 = vsel %vm19_vm2, %v320_v20, 0.0  ;;  %v406_v57 = vrot.slane %v405_v49, 1  ;;  %v388_v7 = vadd.f32 %v387_v58, %v386_v50 }
 0x142   :  { %v383_v1 = vadd.f32 %v382_v54, %v381_v46  ;;  %v413_v25 = vrot.slane %v412_v8, 1 }
 0x143   :  { %v407_v5 = vadd.f32 %v406_v57, %v405_v49  ;;  %v389_v24 = vrot.slane %v388_v7, 1 }
 0x144   :  { %v414_v41 = vadd.f32 %v413_v25, %v412_v8 }
 0x145   :  { %v390_v38 = vadd.f32 %v389_v24, %v388_v7 }
 0x149   :  { %325 = vadd.xlane.f32.xlu2 %v324_v21 }
 0x1a6   :  { %v363_v2 = vpop.xlane.xlu0 %362 }
 0x1a7   :  { %v367_v13 = vsel %vm297_vm7, 0.0, %v363_v2  ;;  %v366_v32 = vpop.xlane.xlu1 %365 }
 0x1a8   :  { %v368_v42 = vsel %vm297_vm7, 0.0, %v366_v32 }
 0x1b4   :  { %v323_v37 = vpop.xlane.xlu2 %322 }
 0x1b5   :  { %1428 = vrcp.f32 %v323_v37  ;;  %v338_v53 = vand.u32 2147483648, %v323_v37  ;;  %v336_v56 = vand.u32 2147483647, %v323_v37  ;;  %vm332_vm9 = vweird.f32 %v323_v37 }
 0x1b7   :  { %v339_v0 = vor.u32 1.1754944e-38, %v338_v53  ;;  %vm337_vm11 = vcmp.eq.f32.partialorder %v336_v56, 8.507059e+37 }
 0x1bb   :  { %v1429_v45 = vpop.eup %1428 }
 0x1bc   :  { %v328_v47 = vmul.f32 %v1429_v45, %v323_v37  ;;  %v326_v48 = vpop.xlane.xlu2 %325  ;;  %vm333_vm8 = vweird.f32 %v1429_v45 }
 0x1bd   :  { %1430 = vrcp.f32 %v326_v48  ;;  %vm334_vm10 = vmor %vm332_vm9, %vm333_vm8  ;;  %v351_v14 = vand.u32 2147483647, %v326_v48  ;;  %v353_v16 = vand.u32 2147483648, %v326_v48  ;;  %vm347_vm13 = vweird.f32 %v326_v48 }
 0x1be   :  { %v329_v52 = vsub.f32 1.0, %v328_v47 }
 0x1bf   :  { %vm352_vm3 = vcmp.eq.f32.partialorder %v351_v14, 8.507059e+37  ;;  %v354_v29 = vor.u32 1.1754944e-38, %v353_v16 }
 0x1c0   :  { %v330_v55 = vmul.f32 %v1429_v45, %v329_v52 }
 0x1c2   :  { %v331_v62 = vadd.f32 %v1429_v45, %v330_v55 }
 0x1c3   :  { %v1431_v63 = vpop.eup %1430 }
 0x1c4   :  { %v335_v3 = vsel %vm334_vm10, %v1429_v45, %v331_v62  ;;  %v343_v4 = vmul.f32 %v1431_v63, %v326_v48  ;;  %vm348_vm12 = vweird.f32 %v1431_v63 }
 0x1c5   :  { %v340_v6 = vsel %vm337_vm11, %v339_v0, %v335_v3  ;;  %vm349_vm15 = vmor %vm347_vm13, %vm348_vm12  ;;  %vm549_vm12 = vcmp.eq.s32.totalorder %v1535_v35, 2 }
 0x1c6   :  { %v357_v9 = vmul.f32 %v340_v6, %v309_v15  ;;  %v344_v10 = vsub.f32 1.0, %v343_v4  ;;  %v391_v11 = vmul.f32 %v383_v1, %v340_v6  ;;  %v415_v12 = vmul.f32 %v407_v5, %v340_v6 }
 0x1c8   :  { %v369_v17 = vmul.f32 %v367_v13, %v357_v9  ;;  %v345_v18 = vmul.f32 %v1431_v63, %v344_v10  ;;  %v393_v20 = vmul.f32 %v391_v11, %v367_v13  ;;  %v417_v21 = vmul.f32 %v415_v12, %v367_v13 }
 0x1ca   :  { %v346_v26 = vadd.f32 %v1431_v63, %v345_v18  ;;  %v371_v15 = vsub.f32 %v1551_v59, %v369_v17  ;;  %v395_v27 = vsub.f32 %v1582_v22, %v393_v20  ;;  %v419_v28 = vsub.f32 %v1584_v23, %v417_v21 }
 0x1cc   :  { %v350_v33 = vsel %vm349_vm15, %v1431_v63, %v346_v26  ;;  %v1615_v34 = vsel %vm297_vm7, %v357_v9, %v371_v15  ;;  %v1619_v37 = vsel %vm297_vm7, %v391_v11, %v395_v27  ;;  %v1623_v59 = vsel %vm297_vm7, %v415_v12, %v419_v28 }
 0x1cd   :  { %v355_v22 = vsel %vm352_vm3, %v354_v29, %v350_v33  ;;  %v427_v23 = vsel %vm423_vm14, %v1615_v34, 0.0  ;;  %v485_v6 = vsel %vm424_vm5, %v1615_v34, 0.0  ;;  %v501_v10 = vsel %vm423_vm14, %v1619_v37, 0.0 }
 0x1ce   :  { %v358_v39 = vmul.f32 %v355_v22, %v1576_v19  ;;  %v429_v40 = vsel %vm19_vm2, %v427_v23, 0.0  ;;  %v392_v44 = vmul.f32 %v390_v38, %v355_v22  ;;  %v416_v46 = vmul.f32 %v414_v41, %v355_v22 }
 0x1cf   :  { %v430_v43 = vrot.slane %v429_v40, 4  ;;  %v487_v7 = vsel %vm19_vm2, %v485_v6, 0.0  ;;  %v525_v11 = vsel %vm423_vm14, %v1623_v59, 0.0  ;;  %v503_v12 = vsel %vm22_vm0, %v501_v10, 0.0 }
 0x1d0   :  { %v370_v45 = vmul.f32 %v368_v42, %v358_v39  ;;  %v394_v48 = vmul.f32 %v392_v44, %v368_v42  ;;  %v418_v50 = vmul.f32 %v416_v46, %v368_v42  ;;  %v527_v13 = vsel %vm25_vm4, %v525_v11, 0.0 }
 0x1d1   :  { %v431_v47 = vadd.f32 %v430_v43, %v429_v40  ;;  %v504_v14 = vrot.slane %v503_v12, 4  ;;  %v528_v18 = vrot.slane %v527_v13, 4  ;;  %vm550_vm3 = vcmp.eq.s32.totalorder %v1537_v36, 2 }
 0x1d2   :  { %v372_v49 = vsub.f32 %v1554_v61, %v370_v45  ;;  %v396_v52 = vsub.f32 %v1596_v31, %v394_v48  ;;  %v420_v53 = vsub.f32 %v1594_v30, %v418_v50 }
 0x1d3   :  { %v432_v51 = vrot.slane %v431_v47, 2  ;;  %v505_v24 = vadd.f32 %v504_v14, %v503_v12  ;;  %v529_v26 = vadd.f32 %v528_v18, %v527_v13 }
 0x1d4   :  { %v1636_v19 = vsel %vm297_vm7, %v358_v39, %v372_v49  ;;  %v1645_v61 = vsel %vm297_vm7, %v392_v44, %v396_v52  ;;  %v1649_v31 = vsel %vm297_vm7, %v416_v46, %v420_v53 }
 0x1d5   :  { %v433_v54 = vadd.f32 %v432_v51, %v431_v47  ;;  %v428_v55 = vsel %vm423_vm14, %v1636_v19, 0.0  ;;  %v486_v8 = vsel %vm424_vm5, %v1636_v19, 0.0  ;;  %v502_v16 = vsel %vm423_vm14, %v1645_v61, 0.0 }
 0x1d6   :  { %v436_v56 = vsel %vm19_vm2, %v428_v55, 0.0  ;;  %v490_v9 = vsel %vm19_vm2, %v486_v8, 0.0  ;;  %v526_v17 = vsel %vm423_vm14, %v1649_v31, 0.0  ;;  %v510_v20 = vsel %vm22_vm0, %v502_v16, 0.0 }
 0x1d7   :  { %v434_v57 = vrot.slane %v433_v54, 1  ;;  %v437_v58 = vrot.slane %v436_v56, 4  ;;  %v534_v21 = vsel %vm25_vm4, %v526_v17, 0.0  ;;  %v511_v15 = vrot.slane %v510_v20, 4 }
 0x1d8   :  { %v535_v27 = vrot.slane %v534_v21, 4  ;;  %v506_v28 = vrot.slane %v505_v24, 2  ;;  %v530_v29 = vrot.slane %v529_v26, 2 }
 0x1d9   :  { %v1651_v60 = vadd.f32 %v434_v57, %v433_v54  ;;  %v438_v30 = vadd.f32 %v437_v58, %v436_v56  ;;  %v512_v32 = vadd.f32 %v511_v15, %v510_v20 }
 0x1da   :  { %v536_v33 = vadd.f32 %v535_v27, %v534_v21  ;;  %v507_v23 = vadd.f32 %v506_v28, %v505_v24  ;;  %v531_v40 = vadd.f32 %v530_v29, %v529_v26 }
 0x1db   :  { %v445_v62 = vsel %vm424_vm5, %v1651_v60, 0.0  ;;  %v439_v63 = vrot.slane %v438_v30, 2  ;;  %v513_v41 = vrot.slane %v512_v32, 2 }
 0x1dc   :  { %v447_v0 = vsel %vm19_vm2, %v445_v62, 0.0  ;;  %v537_v42 = vrot.slane %v536_v33, 2  ;;  %v508_v45 = vrot.slane %v507_v23, 1  ;;  %v532_v48 = vrot.slane %v531_v40, 1 }
 0x1dd   :  { %448 = vadd.xlane.f32.xlu2 %v447_v0  ;;  %v440_v1 = vadd.f32 %v439_v63, %v438_v30  ;;  %v514_v49 = vadd.f32 %v513_v41, %v512_v32 }
 0x1de   :  { %v538_v50 = vadd.f32 %v537_v42, %v536_v33  ;;  %v509_v54 = vadd.f32 %v508_v45, %v507_v23  ;;  %v533_v57 = vadd.f32 %v532_v48, %v531_v40 }
 0x1df   :  { %v441_v2 = vrot.slane %v440_v1, 1  ;;  %v515_v62 = vrot.slane %v514_v49, 1 }
 0x1e0   :  { %v539_v63 = vrot.slane %v538_v50, 1 }
 0x1e1   :  { %v1656_v3 = vadd.f32 %v441_v2, %v440_v1  ;;  %v516_v17 = vadd.f32 %v515_v62, %v514_v49 }
 0x1e2   :  { %v540_v18 = vadd.f32 %v539_v63, %v538_v50 }
 0x1e3   :  { %v446_v4 = vsel %vm424_vm5, %v1656_v3, 0.0 }
 0x1e4   :  { %v450_v5 = vsel %vm19_vm2, %v446_v4, 0.0 }
 0x1e5   :  { %451 = vadd.xlane.f32.xlu2 %v450_v5 }
 0x1ed   :  { %488 = vadd.xlane.f32.xlu2 %v487_v7 }
 0x1f5   :  { %491 = vadd.xlane.f32.xlu2 %v490_v9 }
 0x250   :  { %v449_v25 = vpop.xlane.xlu2 %448 }
 0x251   :  { %1432 = vrcp.f32 %v449_v25  ;;  %v464_v44 = vand.u32 2147483648, %v449_v25  ;;  %v462_v47 = vand.u32 2147483647, %v449_v25  ;;  %vm458_vm7 = vweird.f32 %v449_v25 }
 0x253   :  { %v465_v53 = vor.u32 1.1754944e-38, %v464_v44  ;;  %vm463_vm9 = vcmp.eq.f32.partialorder %v462_v47, 8.507059e+37 }
 0x257   :  { %v1433_v22 = vpop.eup %1432 }
 0x258   :  { %v454_v38 = vmul.f32 %v1433_v22, %v449_v25  ;;  %v452_v39 = vpop.xlane.xlu2 %451  ;;  %vm459_vm6 = vweird.f32 %v1433_v22 }
 0x259   :  { %1434 = vrcp.f32 %v452_v39  ;;  %vm460_vm8 = vmor %vm458_vm7, %vm459_vm6  ;;  %v477_v5 = vand.u32 2147483647, %v452_v39  ;;  %v479_v6 = vand.u32 2147483648, %v452_v39  ;;  %vm473_vm11 = vweird.f32 %v452_v39 }
 0x25a   :  { %v455_v43 = vsub.f32 1.0, %v454_v38 }
 0x25b   :  { %vm478_vm15 = vcmp.eq.f32.partialorder %v477_v5, 8.507059e+37  ;;  %v480_v16 = vor.u32 1.1754944e-38, %v479_v6 }
 0x25c   :  { %v456_v46 = vmul.f32 %v1433_v22, %v455_v43 }
 0x25e   :  { %v457_v51 = vadd.f32 %v1433_v22, %v456_v46 }
 0x25f   :  { %v1435_v52 = vpop.eup %1434 }
 0x260   :  { %v469_v55 = vmul.f32 %v1435_v52, %v452_v39  ;;  %v461_v56 = vsel %vm460_vm8, %v1433_v22, %v457_v51  ;;  %v489_v58 = vpop.xlane.xlu2 %488  ;;  %vm474_vm10 = vweird.f32 %v1435_v52 }
 0x261   :  { %v466_v30 = vsel %vm463_vm9, %v465_v53, %v461_v56  ;;  %v493_v7 = vsel %vm423_vm14, 0.0, %v489_v58  ;;  %vm475_vm13 = vmor %vm473_vm11, %vm474_vm10  ;;  %vm675_vm10 = vcmp.eq.s32.totalorder %v1535_v35, 3 }
 0x262   :  { %v470_v0 = vsub.f32 1.0, %v469_v55  ;;  %v483_v1 = vmul.f32 %v466_v30, %v1651_v60  ;;  %v517_v2 = vmul.f32 %v509_v54, %v466_v30  ;;  %v541_v4 = vmul.f32 %v533_v57, %v466_v30 }
 0x264   :  { %v471_v8 = vmul.f32 %v1435_v52, %v470_v0  ;;  %v495_v9 = vmul.f32 %v493_v7, %v483_v1  ;;  %v519_v10 = vmul.f32 %v517_v2, %v493_v7  ;;  %v543_v11 = vmul.f32 %v541_v4, %v493_v7 }
 0x266   :  { %v472_v12 = vadd.f32 %v1435_v52, %v471_v8  ;;  %v497_v13 = vsub.f32 %v1615_v34, %v495_v9  ;;  %v521_v60 = vsub.f32 %v1619_v37, %v519_v10  ;;  %v545_v14 = vsub.f32 %v1623_v59, %v543_v11 }
 0x268   :  { %v1689_v20 = vsel %vm423_vm14, %v483_v1, %v497_v13  ;;  %v476_v21 = vsel %vm475_vm13, %v1435_v52, %v472_v12  ;;  %v492_v24 = vpop.xlane.xlu2 %491  ;;  %v1693_v25 = vsel %vm423_vm14, %v517_v2, %v521_v60  ;;  %v1697_v34 = vsel %vm423_vm14, %v541_v4, %v545_v14 }
 0x269   :  { %v481_v37 = vsel %vm478_vm15, %v480_v16, %v476_v21  ;;  %v553_v59 = vsel %vm549_vm12, %v1689_v20, 0.0  ;;  %v494_v29 = vsel %vm423_vm14, 0.0, %v492_v24  ;;  %v611_v57 = vsel %vm550_vm3, %v1689_v20, 0.0 }
 0x26a   :  { %v484_v26 = vmul.f32 %v481_v37, %v1656_v3  ;;  %v518_v15 = vmul.f32 %v516_v17, %v481_v37  ;;  %v542_v27 = vmul.f32 %v540_v18, %v481_v37  ;;  %v555_v28 = vsel %vm19_vm2, %v553_v59, 0.0 }
 0x26b   :  { %v556_v32 = vrot.slane %v555_v28, 4  ;;  %v613_v58 = vsel %vm19_vm2, %v611_v57, 0.0  ;;  %v627_v63 = vsel %vm549_vm12, %v1693_v25, 0.0  ;;  %v651_v0 = vsel %vm549_vm12, %v1697_v34, 0.0 }
 0x26c   :  { %v496_v33 = vmul.f32 %v494_v29, %v484_v26  ;;  %v520_v22 = vmul.f32 %v518_v15, %v494_v29  ;;  %v544_v23 = vmul.f32 %v542_v27, %v494_v29  ;;  %v629_v1 = vsel %vm22_vm0, %v627_v63, 0.0 }
 0x26d   :  { %v557_v38 = vadd.f32 %v556_v32, %v555_v28  ;;  %v653_v2 = vsel %vm25_vm4, %v651_v0, 0.0  ;;  %v630_v4 = vrot.slane %v629_v1, 4  ;;  %vm676_vm15 = vcmp.eq.s32.totalorder %v1537_v36, 3 }
 0x26e   :  { %v498_v39 = vsub.f32 %v1636_v19, %v496_v33  ;;  %v522_v40 = vsub.f32 %v1645_v61, %v520_v22  ;;  %v546_v41 = vsub.f32 %v1649_v31, %v544_v23  ;;  %v654_v7 = vrot.slane %v653_v2, 4 }
 0x26f   :  { %v558_v42 = vrot.slane %v557_v38, 2  ;;  %v631_v10 = vadd.f32 %v630_v4, %v629_v1 }
 0x270   :  { %v1711_v3 = vsel %vm423_vm14, %v484_v26, %v498_v39  ;;  %v1715_v43 = vsel %vm423_vm14, %v518_v15, %v522_v40  ;;  %v1719_v44 = vsel %vm423_vm14, %v542_v27, %v546_v41  ;;  %v655_v12 = vadd.f32 %v654_v7, %v653_v2 }
 0x271   :  { %v559_v45 = vadd.f32 %v558_v42, %v557_v38  ;;  %v554_v19 = vsel %vm549_vm12, %v1711_v3, 0.0  ;;  %v612_v30 = vsel %vm550_vm3, %v1711_v3, 0.0  ;;  %v628_v5 = vsel %vm549_vm12, %v1715_v43, 0.0 }
 0x272   :  { %v562_v61 = vsel %vm19_vm2, %v554_v19, 0.0  ;;  %v616_v62 = vsel %vm19_vm2, %v612_v30, 0.0  ;;  %v652_v6 = vsel %vm549_vm12, %v1719_v44, 0.0  ;;  %v636_v8 = vsel %vm22_vm0, %v628_v5, 0.0 }
 0x273   :  { %v560_v31 = vrot.slane %v559_v45, 1  ;;  %v563_v46 = vrot.slane %v562_v61, 4  ;;  %v660_v9 = vsel %vm25_vm4, %v652_v6, 0.0  ;;  %v637_v13 = vrot.slane %v636_v8, 4 }
 0x274   :  { %v661_v60 = vrot.slane %v660_v9, 4  ;;  %v632_v14 = vrot.slane %v631_v10, 2  ;;  %v656_v16 = vrot.slane %v655_v12, 2 }
 0x275   :  { %v1725_v47 = vadd.f32 %v560_v31, %v559_v45  ;;  %v564_v48 = vadd.f32 %v563_v46, %v562_v61  ;;  %v638_v17 = vadd.f32 %v637_v13, %v636_v8 }
 0x276   :  { %v662_v18 = vadd.f32 %v661_v60, %v660_v9  ;;  %v633_v24 = vadd.f32 %v632_v14, %v631_v10  ;;  %v657_v26 = vadd.f32 %v656_v16, %v655_v12 }
 0x277   :  { %v571_v49 = vsel %vm550_vm3, %v1725_v47, 0.0  ;;  %v565_v50 = vrot.slane %v564_v48, 2  ;;  %v639_v15 = vrot.slane %v638_v17, 2 }
 0x278   :  { %v573_v51 = vsel %vm19_vm2, %v571_v49, 0.0  ;;  %v663_v27 = vrot.slane %v662_v18, 2  ;;  %v634_v32 = vrot.slane %v633_v24, 1  ;;  %v658_v23 = vrot.slane %v657_v26, 1 }
 0x279   :  { %574 = vadd.xlane.f32.xlu2 %v573_v51  ;;  %v566_v52 = vadd.f32 %v565_v50, %v564_v48  ;;  %v640_v38 = vadd.f32 %v639_v15, %v638_v17 }
 0x27a   :  { %v664_v39 = vadd.f32 %v663_v27, %v662_v18  ;;  %v635_v45 = vadd.f32 %v634_v32, %v633_v24  ;;  %v659_v31 = vadd.f32 %v658_v23, %v657_v26 }
 0x27b   :  { %v567_v53 = vrot.slane %v566_v52, 1  ;;  %v641_v49 = vrot.slane %v640_v38, 1 }
 0x27c   :  { %v665_v50 = vrot.slane %v664_v39, 1 }
 0x27d   :  { %v1730_v54 = vadd.f32 %v567_v53, %v566_v52  ;;  %v642_v6 = vadd.f32 %v641_v49, %v640_v38 }
 0x27e   :  { %v666_v7 = vadd.f32 %v665_v50, %v664_v39 }
 0x27f   :  { %v572_v55 = vsel %vm550_vm3, %v1730_v54, 0.0 }
 0x280   :  { %v576_v56 = vsel %vm19_vm2, %v572_v55, 0.0 }
 0x281   :  { %577 = vadd.xlane.f32.xlu2 %v576_v56 }
 0x289   :  { %614 = vadd.xlane.f32.xlu2 %v613_v58 }
 0x291   :  { %617 = vadd.xlane.f32.xlu2 %v616_v62 }
 0x2ec   :  { %v575_v11 = vpop.xlane.xlu2 %574 }
 0x2ed   :  { %1436 = vrcp.f32 %v575_v11  ;;  %v590_v29 = vand.u32 2147483648, %v575_v11  ;;  %v588_v22 = vand.u32 2147483647, %v575_v11  ;;  %vm584_vm5 = vweird.f32 %v575_v11 }
 0x2ef   :  { %v591_v42 = vor.u32 1.1754944e-38, %v590_v29  ;;  %vm589_vm7 = vcmp.eq.f32.partialorder %v588_v22, 8.507059e+37 }
 0x2f3   :  { %v1437_v21 = vpop.eup %1436 }
 0x2f4   :  { %v580_v37 = vmul.f32 %v1437_v21, %v575_v11  ;;  %v578_v59 = vpop.xlane.xlu2 %577  ;;  %vm585_vm14 = vweird.f32 %v1437_v21 }
 0x2f5   :  { %1438 = vrcp.f32 %v578_v59  ;;  %vm586_vm6 = vmor %vm584_vm5, %vm585_vm14  ;;  %v603_v56 = vand.u32 2147483647, %v578_v59  ;;  %v605_v57 = vand.u32 2147483648, %v578_v59  ;;  %vm599_vm9 = vweird.f32 %v578_v59 }
 0x2f6   :  { %v581_v28 = vsub.f32 1.0, %v580_v37 }
 0x2f7   :  { %vm604_vm13 = vcmp.eq.f32.partialorder %v603_v56, 8.507059e+37  ;;  %v606_v5 = vor.u32 1.1754944e-38, %v605_v57 }
 0x2f8   :  { %v582_v33 = vmul.f32 %v1437_v21, %v581_v28 }
 0x2fa   :  { %v583_v40 = vadd.f32 %v1437_v21, %v582_v33 }
 0x2fb   :  { %v1439_v41 = vpop.eup %1438 }
 0x2fc   :  { %v595_v19 = vmul.f32 %v1439_v41, %v578_v59  ;;  %v587_v61 = vsel %vm586_vm6, %v1437_v21, %v583_v40  ;;  %v615_v46 = vpop.xlane.xlu2 %614  ;;  %vm600_vm8 = vweird.f32 %v1439_v41 }
 0x2fd   :  { %v592_v48 = vsel %vm589_vm7, %v591_v42, %v587_v61  ;;  %v619_v58 = vsel %vm549_vm12, 0.0, %v615_v46  ;;  %vm601_vm11 = vmor %vm599_vm9, %vm600_vm8  ;;  %vm801_vm8 = vcmp.eq.s32.totalorder %v1535_v35, 4 }
 0x2fe   :  { %v596_v51 = vsub.f32 1.0, %v595_v19  ;;  %v609_v52 = vmul.f32 %v592_v48, %v1725_v47  ;;  %v643_v53 = vmul.f32 %v635_v45, %v592_v48  ;;  %v667_v55 = vmul.f32 %v659_v31, %v592_v48 }
 0x300   :  { %v597_v30 = vmul.f32 %v1439_v41, %v596_v51  ;;  %v621_v62 = vmul.f32 %v619_v58, %v609_v52  ;;  %v645_v63 = vmul.f32 %v643_v53, %v619_v58  ;;  %v669_v0 = vmul.f32 %v667_v55, %v619_v58 }
 0x302   :  { %v598_v1 = vadd.f32 %v1439_v41, %v597_v30  ;;  %v623_v2 = vsub.f32 %v1689_v20, %v621_v62  ;;  %v647_v47 = vsub.f32 %v1693_v25, %v645_v63  ;;  %v671_v4 = vsub.f32 %v1697_v34, %v669_v0 }
 0x304   :  { %v1763_v8 = vsel %vm549_vm12, %v609_v52, %v623_v2  ;;  %v602_v9 = vsel %vm601_vm11, %v1439_v41, %v598_v1  ;;  %v618_v10 = vpop.xlane.xlu2 %617  ;;  %v1767_v11 = vsel %vm549_vm12, %v643_v53, %v647_v47  ;;  %v1771_v20 = vsel %vm549_vm12, %v667_v55, %v671_v4 }
 0x305   :  { %v607_v25 = vsel %vm604_vm13, %v606_v5, %v602_v9  ;;  %v679_v34 = vsel %vm675_vm10, %v1763_v8, 0.0  ;;  %v620_v16 = vsel %vm549_vm12, 0.0, %v618_v10  ;;  %v737_v31 = vsel %vm676_vm15, %v1763_v8, 0.0 }
 0x306   :  { %v610_v12 = vmul.f32 %v607_v25, %v1730_v54  ;;  %v644_v13 = vmul.f32 %v642_v6, %v607_v25  ;;  %v668_v60 = vmul.f32 %v666_v7, %v607_v25  ;;  %v681_v14 = vsel %vm19_vm2, %v679_v34, 0.0 }
 0x307   :  { %v682_v17 = vrot.slane %v681_v14, 4  ;;  %v739_v46 = vsel %vm19_vm2, %v737_v31, 0.0  ;;  %v753_v50 = vsel %vm675_vm10, %v1767_v11, 0.0  ;;  %v777_v51 = vsel %vm675_vm10, %v1771_v20, 0.0 }
 0x308   :  { %v622_v18 = vmul.f32 %v620_v16, %v610_v12  ;;  %v646_v21 = vmul.f32 %v644_v13, %v620_v16  ;;  %v670_v24 = vmul.f32 %v668_v60, %v620_v16  ;;  %v755_v52 = vsel %vm22_vm0, %v753_v50, 0.0 }
 0x309   :  { %v683_v37 = vadd.f32 %v682_v17, %v681_v14  ;;  %v779_v53 = vsel %vm25_vm4, %v777_v51, 0.0  ;;  %v756_v55 = vrot.slane %v755_v52, 4  ;;  %vm802_vm13 = vcmp.eq.s32.totalorder %v1537_v36, 4 }
 0x30a   :  { %v624_v59 = vsub.f32 %v1711_v3, %v622_v18  ;;  %v648_v26 = vsub.f32 %v1715_v43, %v646_v21  ;;  %v672_v15 = vsub.f32 %v1719_v44, %v670_v24  ;;  %v780_v58 = vrot.slane %v779_v53, 4 }
 0x30b   :  { %v684_v27 = vrot.slane %v683_v37, 2  ;;  %v757_v63 = vadd.f32 %v756_v55, %v755_v52 }
 0x30c   :  { %v1785_v54 = vsel %vm549_vm12, %v610_v12, %v624_v59  ;;  %v1789_v28 = vsel %vm549_vm12, %v644_v13, %v648_v26  ;;  %v1793_v29 = vsel %vm549_vm12, %v668_v60, %v672_v15  ;;  %v781_v1 = vadd.f32 %v780_v58, %v779_v53 }
 0x30d   :  { %v685_v32 = vadd.f32 %v684_v27, %v683_v37  ;;  %v680_v3 = vsel %vm675_vm10, %v1785_v54, 0.0  ;;  %v738_v48 = vsel %vm676_vm15, %v1785_v54, 0.0  ;;  %v754_v56 = vsel %vm675_vm10, %v1789_v28, 0.0 }
 0x30e   :  { %v688_v43 = vsel %vm19_vm2, %v680_v3, 0.0  ;;  %v742_v49 = vsel %vm19_vm2, %v738_v48, 0.0  ;;  %v778_v57 = vsel %vm675_vm10, %v1793_v29, 0.0  ;;  %v762_v30 = vsel %vm22_vm0, %v754_v56, 0.0 }
 0x30f   :  { %v686_v44 = vrot.slane %v685_v32, 1  ;;  %v689_v33 = vrot.slane %v688_v43, 4  ;;  %v786_v62 = vsel %vm25_vm4, %v778_v57, 0.0  ;;  %v763_v2 = vrot.slane %v762_v30, 4 }
 0x310   :  { %v787_v47 = vrot.slane %v786_v62, 4  ;;  %v758_v4 = vrot.slane %v757_v63, 2  ;;  %v782_v5 = vrot.slane %v781_v1, 2 }
 0x311   :  { %v1799_v22 = vadd.f32 %v686_v44, %v685_v32  ;;  %v690_v23 = vadd.f32 %v689_v33, %v688_v43  ;;  %v764_v6 = vadd.f32 %v763_v2, %v762_v30 }
 0x312   :  { %v788_v7 = vadd.f32 %v787_v47, %v786_v62  ;;  %v759_v10 = vadd.f32 %v758_v4, %v757_v63  ;;  %v783_v12 = vadd.f32 %v782_v5, %v781_v1 }
 0x313   :  { %v697_v38 = vsel %vm676_vm15, %v1799_v22, 0.0  ;;  %v691_v39 = vrot.slane %v690_v23, 2  ;;  %v765_v13 = vrot.slane %v764_v6, 2 }
 0x314   :  { %v699_v40 = vsel %vm19_vm2, %v697_v38, 0.0  ;;  %v789_v60 = vrot.slane %v788_v7, 2  ;;  %v760_v17 = vrot.slane %v759_v10, 1  ;;  %v784_v24 = vrot.slane %v783_v12, 1 }
 0x315   :  { %700 = vadd.xlane.f32.xlu2 %v699_v40  ;;  %v692_v41 = vadd.f32 %v691_v39, %v690_v23  ;;  %v766_v37 = vadd.f32 %v765_v13, %v764_v6 }
 0x316   :  { %v790_v59 = vadd.f32 %v789_v60, %v788_v7  ;;  %v761_v32 = vadd.f32 %v760_v17, %v759_v10  ;;  %v785_v44 = vadd.f32 %v784_v24, %v783_v12 }
 0x317   :  { %v693_v42 = vrot.slane %v692_v41, 1  ;;  %v767_v38 = vrot.slane %v766_v37, 1 }
 0x318   :  { %v791_v39 = vrot.slane %v790_v59, 1 }
 0x319   :  { %v1804_v45 = vadd.f32 %v693_v42, %v692_v41  ;;  %v768_v57 = vadd.f32 %v767_v38, %v766_v37 }
 0x31a   :  { %v792_v58 = vadd.f32 %v791_v39, %v790_v59 }
 0x31b   :  { %v698_v19 = vsel %vm676_vm15, %v1804_v45, 0.0 }
 0x31c   :  { %v702_v61 = vsel %vm19_vm2, %v698_v19, 0.0 }
 0x31d   :  { %703 = vadd.xlane.f32.xlu2 %v702_v61 }
 0x325   :  { %740 = vadd.xlane.f32.xlu2 %v739_v46 }
 0x32d   :  { %743 = vadd.xlane.f32.xlu2 %v742_v49 }
 0x388   :  { %v701_v0 = vpop.xlane.xlu2 %700 }
 0x389   :  { %1440 = vrcp.f32 %v701_v0  ;;  %v716_v16 = vand.u32 2147483648, %v701_v0  ;;  %v714_v21 = vand.u32 2147483647, %v701_v0  ;;  %vm710_vm3 = vweird.f32 %v701_v0 }
 0x38b   :  { %v717_v27 = vor.u32 1.1754944e-38, %v716_v16  ;;  %vm715_vm5 = vcmp.eq.f32.partialorder %v714_v21, 8.507059e+37 }
 0x38f   :  { %v1441_v9 = vpop.eup %1440 }
 0x390   :  { %v706_v25 = vmul.f32 %v1441_v9, %v701_v0  ;;  %v704_v34 = vpop.xlane.xlu2 %703  ;;  %vm711_vm12 = vweird.f32 %v1441_v9 }
 0x391   :  { %1442 = vrcp.f32 %v704_v34  ;;  %vm712_vm14 = vmor %vm710_vm3, %vm711_vm12  ;;  %v729_v61 = vand.u32 2147483647, %v704_v34  ;;  %v731_v31 = vand.u32 2147483648, %v704_v34  ;;  %vm725_vm7 = vweird.f32 %v704_v34 }
 0x392   :  { %v707_v14 = vsub.f32 1.0, %v706_v25 }
 0x393   :  { %vm730_vm11 = vcmp.eq.f32.partialorder %v729_v61, 8.507059e+37  ;;  %v732_v56 = vor.u32 1.1754944e-38, %v731_v31 }
 0x394   :  { %v708_v18 = vmul.f32 %v1441_v9, %v707_v14 }
 0x396   :  { %v709_v26 = vadd.f32 %v1441_v9, %v708_v18 }
 0x397   :  { %v1443_v15 = vpop.eup %1442 }
 0x398   :  { %v721_v3 = vmul.f32 %v1443_v15, %v704_v34  ;;  %v713_v43 = vsel %vm712_vm14, %v1441_v9, %v709_v26  ;;  %v741_v33 = vpop.xlane.xlu2 %740  ;;  %vm726_vm6 = vweird.f32 %v1443_v15 }
 0x399   :  { %v718_v23 = vsel %vm715_vm5, %v717_v27, %v713_v43  ;;  %v745_v46 = vsel %vm675_vm10, 0.0, %v741_v33  ;;  %vm727_vm9 = vmor %vm725_vm7, %vm726_vm6  ;;  %vm928_vm6 = vcmp.eq.s32.totalorder %v1537_v36, 5 }
 0x39a   :  { %v722_v40 = vsub.f32 1.0, %v721_v3  ;;  %v735_v41 = vmul.f32 %v718_v23, %v1799_v22  ;;  %v769_v42 = vmul.f32 %v761_v32, %v718_v23  ;;  %v793_v19 = vmul.f32 %v785_v44, %v718_v23 }
 0x39c   :  { %v723_v48 = vmul.f32 %v1443_v15, %v722_v40  ;;  %v747_v49 = vmul.f32 %v745_v46, %v735_v41  ;;  %v771_v50 = vmul.f32 %v769_v42, %v745_v46  ;;  %v795_v51 = vmul.f32 %v793_v19, %v745_v46 }
 0x39e   :  { %v724_v52 = vadd.f32 %v1443_v15, %v723_v48  ;;  %v749_v53 = vsub.f32 %v1763_v8, %v747_v49  ;;  %v773_v22 = vsub.f32 %v1767_v11, %v771_v50  ;;  %v797_v55 = vsub.f32 %v1771_v20, %v795_v51 }
 0x3a0   :  { %v1837_v30 = vsel %vm675_vm10, %v735_v41, %v749_v53  ;;  %v728_v62 = vsel %vm727_vm9, %v1443_v15, %v724_v52  ;;  %v744_v63 = vpop.xlane.xlu2 %743  ;;  %v1841_v0 = vsel %vm675_vm10, %v769_v42, %v773_v22  ;;  %v1845_v8 = vsel %vm675_vm10, %v793_v19, %v797_v55 }
 0x3a1   :  { %v733_v11 = vsel %vm730_vm11, %v732_v56, %v728_v62  ;;  %v805_v20 = vsel %vm801_vm8, %v1837_v30, 0.0  ;;  %v746_v5 = vsel %vm675_vm10, 0.0, %v744_v63  ;;  %v863_v32 = vsel %vm802_vm13, %v1837_v30, 0.0 }
 0x3a2   :  { %v736_v1 = vmul.f32 %v733_v11, %v1804_v45  ;;  %v770_v2 = vmul.f32 %v768_v57, %v733_v11  ;;  %v794_v47 = vmul.f32 %v792_v58, %v733_v11  ;;  %v807_v4 = vsel %vm19_vm2, %v805_v20, 0.0 }
 0x3a3   :  { %v808_v6 = vrot.slane %v807_v4, 4  ;;  %v865_v44 = vsel %vm19_vm2, %v863_v32, 0.0  ;;  %v879_v39 = vsel %vm801_vm8, %v1841_v0, 0.0  ;;  %v903_v40 = vsel %vm801_vm8, %v1845_v8, 0.0 }
 0x3a4   :  { %v748_v7 = vmul.f32 %v746_v5, %v736_v1  ;;  %v772_v9 = vmul.f32 %v770_v2, %v746_v5  ;;  %v796_v10 = vmul.f32 %v794_v47, %v746_v5  ;;  %v881_v41 = vsel %vm22_vm0, %v879_v39, 0.0 }
 0x3a5   :  { %v809_v25 = vadd.f32 %v808_v6, %v807_v4  ;;  %v905_v42 = vsel %vm25_vm4, %v903_v40, 0.0  ;;  %v882_v19 = vrot.slane %v881_v41, 4  ;;  %vm927_vm11 = vcmp.eq.s32.totalorder %v1535_v35, 5 }
 0x3a6   :  { %v750_v34 = vsub.f32 %v1785_v54, %v748_v7  ;;  %v774_v12 = vsub.f32 %v1789_v28, %v772_v9  ;;  %v798_v13 = vsub.f32 %v1793_v29, %v796_v10  ;;  %v906_v31 = vrot.slane %v905_v42, 4 }
 0x3a7   :  { %v810_v60 = vrot.slane %v809_v25, 2  ;;  %v883_v48 = vadd.f32 %v882_v19, %v881_v41 }
 0x3a8   :  { %v1859_v45 = vsel %vm675_vm10, %v736_v1, %v750_v34  ;;  %v1863_v14 = vsel %vm675_vm10, %v770_v2, %v774_v12  ;;  %v1867_v16 = vsel %vm675_vm10, %v794_v47, %v798_v13  ;;  %v907_v51 = vadd.f32 %v906_v31, %v905_v42 }
 0x3a9   :  { %v811_v17 = vadd.f32 %v810_v60, %v809_v25  ;;  %v806_v54 = vsel %vm801_vm8, %v1859_v45, 0.0  ;;  %v864_v23 = vsel %vm802_vm13, %v1859_v45, 0.0  ;;  %v880_v61 = vsel %vm801_vm8, %v1863_v14, 0.0 }
 0x3aa   :  { %v814_v28 = vsel %vm19_vm2, %v806_v54, 0.0  ;;  %v868_v38 = vsel %vm19_vm2, %v864_v23, 0.0  ;;  %v888_v46 = vsel %vm22_vm0, %v880_v61, 0.0  ;;  %v904_v49 = vsel %vm801_vm8, %v1867_v16, 0.0 }
 0x3ab   :  { %v812_v29 = vrot.slane %v811_v17, 1  ;;  %v815_v18 = vrot.slane %v814_v28, 4  ;;  %v889_v52 = vrot.slane %v888_v46, 4  ;;  %v912_v53 = vsel %vm25_vm4, %v904_v49, 0.0 }
 0x3ac   :  { %v884_v22 = vrot.slane %v883_v48, 2  ;;  %v908_v55 = vrot.slane %v907_v51, 2  ;;  %v913_v57 = vrot.slane %v912_v53, 4 }
 0x3ad   :  { %v1873_v21 = vadd.f32 %v812_v29, %v811_v17  ;;  %v816_v24 = vadd.f32 %v815_v18, %v814_v28  ;;  %v890_v56 = vadd.f32 %v889_v52, %v888_v46 }
 0x3ae   :  { %v885_v62 = vadd.f32 %v884_v22, %v883_v48  ;;  %v909_v11 = vadd.f32 %v908_v55, %v907_v51  ;;  %v914_v2 = vadd.f32 %v913_v57, %v912_v53 }
 0x3af   :  { %v823_v37 = vsel %vm802_vm13, %v1873_v21, 0.0  ;;  %v817_v59 = vrot.slane %v816_v24, 2  ;;  %v891_v1 = vrot.slane %v890_v56, 2 }
 0x3b0   :  { %v825_v26 = vsel %vm19_vm2, %v823_v37, 0.0  ;;  %v886_v5 = vrot.slane %v885_v62, 1  ;;  %v910_v9 = vrot.slane %v909_v11, 1  ;;  %v915_v25 = vrot.slane %v914_v2, 2 }
 0x3b1   :  { %826 = vadd.xlane.f32.xlu1 %v825_v26  ;;  %v818_v15 = vadd.f32 %v817_v59, %v816_v24  ;;  %v892_v10 = vadd.f32 %v891_v1, %v890_v56 }
 0x3b2   :  { %v887_v60 = vadd.f32 %v886_v5, %v885_v62  ;;  %v911_v54 = vadd.f32 %v910_v9, %v909_v11  ;;  %v916_v37 = vadd.f32 %v915_v25, %v914_v2 }
 0x3b3   :  { %v819_v27 = vrot.slane %v818_v15, 1  ;;  %v893_v24 = vrot.slane %v892_v10, 1 }
 0x3b4   :  { %v917_v40 = vrot.slane %v916_v37, 1 }
 0x3b5   :  { %v1879_v3 = vadd.f32 %v819_v27, %v818_v15  ;;  %v894_v31 = vadd.f32 %v893_v24, %v892_v10 }
 0x3b7   :  { %v824_v43 = vsel %vm802_vm13, %v1879_v3, 0.0 }
 0x3b8   :  { %v828_v33 = vsel %vm19_vm2, %v824_v43, 0.0 }
 0x3b9   :  { %866 = vadd.xlane.f32.xlu1 %v865_v44  ;;  %829 = vadd.xlane.f32.xlu2 %v828_v33 }
 0x3c1   :  { %869 = vadd.xlane.f32.xlu2 %v868_v38 }
 0x424   :  { %v827_v50 = vpop.xlane.xlu1 %826 }
 0x425   :  { %1444 = vrcp.f32 %v827_v50  ;;  %v842_v4 = vand.u32 2147483648, %v827_v50  ;;  %v840_v7 = vand.u32 2147483647, %v827_v50  ;;  %vm836_vm15 = vweird.f32 %v827_v50 }
 0x427   :  { %v843_v13 = vor.u32 1.1754944e-38, %v842_v4  ;;  %vm841_vm3 = vcmp.eq.f32.partialorder %v840_v7, 8.507059e+37 }
 0x42b   :  { %v1445_v58 = vpop.eup %1444 }
 0x42c   :  { %v832_v63 = vmul.f32 %v1445_v58, %v827_v50  ;;  %v830_v20 = vpop.xlane.xlu2 %829  ;;  %vm837_vm10 = vweird.f32 %v1445_v58  ;;  %v867_v28 = vpop.xlane.xlu1 %866 }
 0x42d   :  { %1446 = vrcp.f32 %v830_v20  ;;  %vm838_vm12 = vmor %vm836_vm15, %vm837_vm10  ;;  %v871_v32 = vsel %vm801_vm8, 0.0, %v867_v28  ;;  %v855_v43 = vand.u32 2147483647, %v830_v20  ;;  %v857_v44 = vand.u32 2147483648, %v830_v20 }
 0x42e   :  { %v833_v47 = vsub.f32 1.0, %v832_v63  ;;  %vm851_vm5 = vweird.f32 %v830_v20 }
 0x42f   :  { %vm856_vm9 = vcmp.eq.f32.partialorder %v855_v43, 8.507059e+37  ;;  %v858_v61 = vor.u32 1.1754944e-38, %v857_v44 }
 0x430   :  { %v834_v6 = vmul.f32 %v1445_v58, %v833_v47 }
 0x432   :  { %v835_v34 = vadd.f32 %v1445_v58, %v834_v6 }
 0x433   :  { %v1447_v12 = vpop.eup %1446 }
 0x434   :  { %v839_v17 = vsel %vm838_vm12, %v1445_v58, %v835_v34  ;;  %v847_v29 = vmul.f32 %v1447_v12, %v830_v20  ;;  %vm852_vm14 = vweird.f32 %v1447_v12  ;;  %v870_v50 = vpop.xlane.xlu2 %869 }
 0x435   :  { %v844_v18 = vsel %vm841_vm3, %v843_v13, %v839_v17  ;;  %vm853_vm7 = vmor %vm851_vm5, %vm852_vm14  ;;  %v872_v55 = vsel %vm801_vm8, 0.0, %v870_v50  ;;  %vm1053_vm14 = vcmp.eq.s32.totalorder %v1535_v35, 6  ;;  %vm1054_vm5 = vcmp.eq.s32.totalorder %v1537_v36, 6 }
 0x436   :  { %v861_v59 = vmul.f32 %v844_v18, %v1873_v21  ;;  %v895_v26 = vmul.f32 %v887_v60, %v844_v18  ;;  %v919_v15 = vmul.f32 %v911_v54, %v844_v18  ;;  %v848_v27 = vsub.f32 1.0, %v847_v29 }
 0x438   :  { %v873_v33 = vmul.f32 %v871_v32, %v861_v59  ;;  %v897_v23 = vmul.f32 %v895_v26, %v871_v32  ;;  %v921_v38 = vmul.f32 %v919_v15, %v871_v32  ;;  %v849_v39 = vmul.f32 %v1447_v12, %v848_v27 }
 0x43a   :  { %v875_v41 = vsub.f32 %v1837_v30, %v873_v33  ;;  %v899_v21 = vsub.f32 %v1841_v0, %v897_v23  ;;  %v923_v42 = vsub.f32 %v1845_v8, %v921_v38  ;;  %v850_v19 = vadd.f32 %v1447_v12, %v849_v39 }
 0x43b   :  { %v918_v8 = vadd.f32 %v917_v40, %v916_v37 }
 0x43c   :  { %v1911_v46 = vsel %vm801_vm8, %v895_v26, %v899_v21  ;;  %v1915_v48 = vsel %vm801_vm8, %v919_v15, %v923_v42  ;;  %v854_v49 = vsel %vm853_vm7, %v1447_v12, %v850_v19  ;;  %v1919_v30 = vsel %vm801_vm8, %v861_v59, %v875_v41 }
 0x43d   :  { %v859_v0 = vsel %vm856_vm9, %v858_v61, %v854_v49  ;;  %v989_v51 = vsel %vm928_vm6, %v1919_v30, 0.0  ;;  %v931_v62 = vsel %vm927_vm11, %v1919_v30, 0.0  ;;  %v1005_v59 = vsel %vm927_vm11, %v1911_v46, 0.0 }
 0x43e   :  { %v862_v52 = vmul.f32 %v859_v0, %v1879_v3  ;;  %v896_v53 = vmul.f32 %v894_v31, %v859_v0  ;;  %v920_v22 = vmul.f32 %v918_v8, %v859_v0  ;;  %v991_v56 = vsel %vm19_vm2, %v989_v51, 0.0 }
 0x43f   :  { %992 = vadd.xlane.f32.xlu0 %v991_v56  ;;  %v933_v11 = vsel %vm19_vm2, %v931_v62, 0.0  ;;  %v1029_v26 = vsel %vm927_vm11, %v1915_v48, 0.0  ;;  %v1007_v15 = vsel %vm22_vm0, %v1005_v59, 0.0 }
 0x440   :  { %v874_v57 = vmul.f32 %v872_v55, %v862_v52  ;;  %v898_v58 = vmul.f32 %v896_v53, %v872_v55  ;;  %v922_v63 = vmul.f32 %v920_v22, %v872_v55  ;;  %v934_v1 = vrot.slane %v933_v11, 4 }
 0x441   :  { %v1031_v27 = vsel %vm25_vm4, %v1029_v26, 0.0  ;;  %v1008_v32 = vrot.slane %v1007_v15, 4 }
 0x442   :  { %v876_v20 = vsub.f32 %v1859_v45, %v874_v57  ;;  %v900_v3 = vsub.f32 %v1863_v14, %v898_v58  ;;  %v924_v2 = vsub.f32 %v1867_v16, %v922_v63  ;;  %v935_v4 = vadd.f32 %v934_v1, %v933_v11 }
 0x443   :  { %v1032_v44 = vrot.slane %v1031_v27, 4  ;;  %v1009_v23 = vadd.f32 %v1008_v32, %v1007_v15 }
 0x444   :  { %v1938_v47 = vsel %vm801_vm8, %v896_v53, %v900_v3  ;;  %v1942_v5 = vsel %vm801_vm8, %v920_v22, %v924_v2  ;;  %v1946_v6 = vsel %vm801_vm8, %v862_v52, %v876_v20  ;;  %v936_v7 = vrot.slane %v935_v4, 2 }
 0x445   :  { %v932_v14 = vsel %vm927_vm11, %v1946_v6, 0.0  ;;  %v990_v28 = vsel %vm928_vm6, %v1946_v6, 0.0  ;;  %v1006_v43 = vsel %vm927_vm11, %v1938_v47, 0.0  ;;  %v1030_v38 = vsel %vm927_vm11, %v1942_v5, 0.0 }
 0x446   :  { %v937_v45 = vadd.f32 %v936_v7, %v935_v4  ;;  %v940_v16 = vsel %vm19_vm2, %v932_v14, 0.0  ;;  %v994_v24 = vsel %vm19_vm2, %v990_v28, 0.0  ;;  %v1014_v33 = vsel %vm22_vm0, %v1006_v43, 0.0 }
 0x447   :  { %v941_v10 = vrot.slane %v940_v16, 4  ;;  %v1033_v39 = vadd.f32 %v1032_v44, %v1031_v27  ;;  %v1015_v41 = vrot.slane %v1014_v33, 4  ;;  %v1038_v21 = vsel %vm25_vm4, %v1030_v38, 0.0 }
 0x448   :  { %v938_v9 = vrot.slane %v937_v45, 1  ;;  %v1010_v42 = vrot.slane %v1009_v23, 2  ;;  %v1039_v31 = vrot.slane %v1038_v21, 4 }
 0x449   :  { %v942_v34 = vadd.f32 %v941_v10, %v940_v16  ;;  %v1034_v19 = vrot.slane %v1033_v39, 2  ;;  %v1016_v61 = vadd.f32 %v1015_v41, %v1014_v33 }
 0x44a   :  { %v1952_v25 = vadd.f32 %v938_v9, %v937_v45  ;;  %v1011_v50 = vadd.f32 %v1010_v42, %v1009_v23  ;;  %v1040_v53 = vadd.f32 %v1039_v31, %v1038_v21 }
 0x44b   :  { %v943_v13 = vrot.slane %v942_v34, 2  ;;  %v1035_v0 = vadd.f32 %v1034_v19, %v1033_v39  ;;  %v1017_v52 = vrot.slane %v1016_v61, 2 }
 0x44c   :  { %v949_v12 = vsel %vm928_vm6, %v1952_v25, 0.0  ;;  %v1012_v55 = vrot.slane %v1011_v50, 1  ;;  %v1041_v63 = vrot.slane %v1040_v53, 2 }
 0x44d   :  { %v951_v60 = vsel %vm19_vm2, %v949_v12, 0.0  ;;  %v944_v17 = vadd.f32 %v943_v13, %v942_v34  ;;  %v1036_v57 = vrot.slane %v1035_v0, 1  ;;  %v1018_v11 = vadd.f32 %v1017_v52, %v1016_v61 }
 0x44e   :  { %952 = vadd.xlane.f32.xlu1 %v951_v60  ;;  %v1013_v2 = vadd.f32 %v1012_v55, %v1011_v50  ;;  %v1042_v10 = vadd.f32 %v1041_v63, %v1040_v53 }
 0x44f   :  { %v945_v54 = vrot.slane %v944_v17, 1  ;;  %v1037_v14 = vadd.f32 %v1036_v57, %v1035_v0  ;;  %v1019_v9 = vrot.slane %v1018_v11, 1 }
 0x450   :  { %v1043_v26 = vrot.slane %v1042_v10, 1 }
 0x451   :  { %v1961_v29 = vadd.f32 %v945_v54, %v944_v17  ;;  %v1020_v44 = vadd.f32 %v1019_v9, %v1018_v11 }
 0x452   :  { %v1044_v41 = vadd.f32 %v1043_v26, %v1042_v10 }
 0x453   :  { %v950_v18 = vsel %vm928_vm6, %v1961_v29, 0.0 }
 0x454   :  { %v954_v37 = vsel %vm19_vm2, %v950_v18, 0.0 }
 0x455   :  { %955 = vadd.xlane.f32.xlu2 %v954_v37 }
 0x456   :  { %995 = vadd.xlane.f32.xlu1 %v994_v24 }
 0x4b2   :  { %v993_v4 = vpop.xlane.xlu0 %992 }
 0x4b3   :  { %v997_v17 = vsel %vm927_vm11, 0.0, %v993_v4 }
 0x4c1   :  { %v953_v40 = vpop.xlane.xlu1 %952 }
 0x4c2   :  { %1448 = vrcp.f32 %v953_v40  ;;  %v968_v56 = vand.u32 2147483648, %v953_v40  ;;  %v966_v62 = vand.u32 2147483647, %v953_v40  ;;  %vm962_vm13 = vweird.f32 %v953_v40 }
 0x4c4   :  { %v969_v1 = vor.u32 1.1754944e-38, %v968_v56  ;;  %vm967_vm15 = vcmp.eq.f32.partialorder %v966_v62, 8.507059e+37 }
 0x4c8   :  { %v1449_v49 = vpop.eup %1448  ;;  %v956_v51 = vpop.xlane.xlu2 %955 }
 0x4c9   :  { %v958_v8 = vmul.f32 %v1449_v49, %v953_v40  ;;  %1450 = vrcp.f32 %v956_v51  ;;  %vm963_vm8 = vweird.f32 %v1449_v49  ;;  %v981_v54 = vand.u32 2147483647, %v956_v51  ;;  %v996_v33 = vpop.xlane.xlu1 %995 }
 0x4ca   :  { %vm964_vm10 = vmor %vm962_vm13, %vm963_vm8  ;;  %v983_v28 = vand.u32 2147483648, %v956_v51  ;;  %vm977_vm3 = vweird.f32 %v956_v51  ;;  %v998_v31 = vsel %vm927_vm11, 0.0, %v996_v33 }
 0x4cb   :  { %v959_v22 = vsub.f32 1.0, %v958_v8  ;;  %vm982_vm7 = vcmp.eq.f32.partialorder %v981_v54, 8.507059e+37 }
 0x4cc   :  { %v984_v43 = vor.u32 1.1754944e-38, %v983_v28 }
 0x4cd   :  { %v960_v58 = vmul.f32 %v1449_v49, %v959_v22 }
 0x4cf   :  { %v961_v20 = vadd.f32 %v1449_v49, %v960_v58  ;;  %v1451_v3 = vpop.eup %1450 }
 0x4d0   :  { %v973_v45 = vmul.f32 %v1451_v3, %v956_v51  ;;  %vm978_vm12 = vweird.f32 %v1451_v3 }
 0x4d1   :  { %v965_v7 = vsel %vm964_vm10, %v1449_v49, %v961_v20  ;;  %vm979_vm6 = vmor %vm977_vm3, %vm978_vm12  ;;  %vm1180_vm12 = vcmp.eq.s32.totalorder %v1537_v36, 7 }
 0x4d2   :  { %v970_v16 = vsel %vm967_vm15, %v969_v1, %v965_v7  ;;  %v974_v34 = vsub.f32 1.0, %v973_v45  ;;  %vm1179_vm15 = vcmp.eq.s32.totalorder %v1535_v35, 7 }
 0x4d3   :  { %v987_v12 = vmul.f32 %v970_v16, %v1952_v25  ;;  %v1021_v13 = vmul.f32 %v1013_v2, %v970_v16  ;;  %v1045_v60 = vmul.f32 %v1037_v14, %v970_v16 }
 0x4d4   :  { %v975_v18 = vmul.f32 %v1451_v3, %v974_v34 }
 0x4d5   :  { %v999_v24 = vmul.f32 %v997_v17, %v987_v12  ;;  %v1023_v37 = vmul.f32 %v1021_v13, %v997_v17  ;;  %v1047_v59 = vmul.f32 %v1045_v60, %v997_v17 }
 0x4d6   :  { %v976_v15 = vadd.f32 %v1451_v3, %v975_v18 }
 0x4d7   :  { %v1001_v25 = vsub.f32 %v1919_v30, %v999_v24  ;;  %v1025_v27 = vsub.f32 %v1911_v46, %v1023_v37  ;;  %v1049_v32 = vsub.f32 %v1915_v48, %v1047_v59 }
 0x4d8   :  { %v980_v23 = vsel %vm979_vm6, %v1451_v3, %v976_v15 }
 0x4d9   :  { %v1995_v38 = vsel %vm927_vm11, %v987_v12, %v1001_v25  ;;  %v1999_v39 = vsel %vm927_vm11, %v1045_v60, %v1049_v32  ;;  %v2003_v46 = vsel %vm927_vm11, %v1021_v13, %v1025_v27  ;;  %v985_v40 = vsel %vm982_vm7, %v984_v43, %v980_v23 }
 0x4da   :  { %v1057_v48 = vsel %vm1053_vm14, %v1995_v38, 0.0  ;;  %v1115_v30 = vsel %vm1054_vm5, %v1995_v38, 0.0  ;;  %v988_v19 = vmul.f32 %v985_v40, %v1961_v29  ;;  %v1022_v61 = vmul.f32 %v1020_v44, %v985_v40 }
 0x4db   :  { %v1059_v21 = vsel %vm19_vm2, %v1057_v48, 0.0  ;;  %v1117_v42 = vsel %vm19_vm2, %v1115_v30, 0.0  ;;  %v1046_v50 = vmul.f32 %v1044_v41, %v985_v40  ;;  %v1155_v34 = vsel %vm1053_vm14, %v1999_v39, 0.0 }
 0x4dc   :  { %v1060_v49 = vrot.slane %v1059_v21, 4  ;;  %1118 = vadd.xlane.f32.xlu1 %v1117_v42  ;;  %v1000_v0 = vmul.f32 %v998_v31, %v988_v19  ;;  %v1024_v8 = vmul.f32 %v1022_v61, %v998_v31  ;;  %v1131_v12 = vsel %vm1053_vm14, %v2003_v46, 0.0 }
 0x4dd   :  { %v1048_v52 = vmul.f32 %v1046_v50, %v998_v31  ;;  %v1157_v13 = vsel %vm25_vm4, %v1155_v34, 0.0  ;;  %v1133_v60 = vsel %vm22_vm0, %v1131_v12, 0.0 }
 0x4de   :  { %v1061_v51 = vadd.f32 %v1060_v49, %v1059_v21  ;;  %v1002_v53 = vsub.f32 %v1946_v6, %v1000_v0  ;;  %v1026_v22 = vsub.f32 %v1938_v47, %v1024_v8  ;;  %v1158_v28 = vrot.slane %v1157_v13, 4 }
 0x4df   :  { %v1050_v56 = vsub.f32 %v1942_v5, %v1048_v52  ;;  %v1134_v18 = vrot.slane %v1133_v60, 4 }
 0x4e0   :  { %v1062_v55 = vrot.slane %v1061_v51, 2  ;;  %v2021_v29 = vsel %vm927_vm11, %v988_v19, %v1002_v53  ;;  %v2025_v57 = vsel %vm927_vm11, %v1022_v61, %v1026_v22  ;;  %v1159_v26 = vadd.f32 %v1158_v28, %v1157_v13 }
 0x4e1   :  { %v1058_v62 = vsel %vm1053_vm14, %v2021_v29, 0.0  ;;  %v2032_v6 = vsel %vm927_vm11, %v1046_v50, %v1050_v56  ;;  %v1116_v45 = vsel %vm1054_vm5, %v2021_v29, 0.0  ;;  %v1132_v17 = vsel %vm1053_vm14, %v2025_v57, 0.0 }
 0x4e2   :  { %v1063_v58 = vadd.f32 %v1062_v55, %v1061_v51  ;;  %v1066_v47 = vsel %vm19_vm2, %v1058_v62, 0.0  ;;  %v1120_v9 = vsel %vm19_vm2, %v1116_v45, 0.0  ;;  %v1156_v54 = vsel %vm1053_vm14, %v2032_v6, 0.0 }
 0x4e3   :  { %v1067_v63 = vrot.slane %v1066_v47, 4  ;;  %v1140_v24 = vsel %vm22_vm0, %v1132_v17, 0.0  ;;  %v1164_v37 = vsel %vm25_vm4, %v1156_v54, 0.0  ;;  %v1135_v27 = vadd.f32 %v1134_v18, %v1133_v60 }
 0x4e4   :  { %v1064_v5 = vrot.slane %v1063_v58, 1  ;;  %v1141_v15 = vrot.slane %v1140_v24, 4  ;;  %v1165_v25 = vrot.slane %v1164_v37, 4  ;;  %v1160_v32 = vrot.slane %v1159_v26, 2 }
 0x4e5   :  { %v1068_v20 = vadd.f32 %v1067_v63, %v1066_v47  ;;  %v1136_v33 = vrot.slane %v1135_v27, 2 }
 0x4e6   :  { %v2035_v11 = vadd.f32 %v1064_v5, %v1063_v58  ;;  %v1142_v43 = vadd.f32 %v1141_v15, %v1140_v24  ;;  %v1166_v44 = vadd.f32 %v1165_v25, %v1164_v37  ;;  %v1161_v40 = vadd.f32 %v1160_v32, %v1159_v26 }
 0x4e7   :  { %v1069_v1 = vrot.slane %v1068_v20, 2  ;;  %v1137_v42 = vadd.f32 %v1136_v33, %v1135_v27 }
 0x4e8   :  { %v1075_v3 = vsel %vm1054_vm5, %v2035_v11, 0.0  ;;  %v1143_v41 = vrot.slane %v1142_v43, 2  ;;  %v1167_v21 = vrot.slane %v1166_v44, 2  ;;  %v1162_v50 = vrot.slane %v1161_v40, 1 }
 0x4e9   :  { %v1077_v2 = vsel %vm19_vm2, %v1075_v3, 0.0  ;;  %v1070_v4 = vadd.f32 %v1069_v1, %v1068_v20  ;;  %v1138_v51 = vrot.slane %v1137_v42, 1 }
 0x4ea   :  { %1078 = vadd.xlane.f32.xlu2 %v1077_v2  ;;  %v1144_v0 = vadd.f32 %v1143_v41, %v1142_v43  ;;  %v1168_v8 = vadd.f32 %v1167_v21, %v1166_v44  ;;  %v1163_v62 = vadd.f32 %v1162_v50, %v1161_v40 }
 0x4eb   :  { %v1071_v7 = vrot.slane %v1070_v4, 1  ;;  %v1139_v20 = vadd.f32 %v1138_v51, %v1137_v42 }
 0x4ec   :  { %v1145_v47 = vrot.slane %v1144_v0, 1  ;;  %v1169_v5 = vrot.slane %v1168_v8, 1 }
 0x4ed   :  { %v2044_v14 = vadd.f32 %v1071_v7, %v1070_v4 }
 0x4ee   :  { %v1146_v28 = vadd.f32 %v1145_v47, %v1144_v0  ;;  %v1170_v18 = vadd.f32 %v1169_v5, %v1168_v8 }
 0x4ef   :  { %v1076_v16 = vsel %vm1054_vm5, %v2044_v14, 0.0 }
 0x4f0   :  { %v1080_v10 = vsel %vm19_vm2, %v1076_v16, 0.0  ;;  %v1468_v16 = vmov 0  }
 0x4f1   :  { %1081 = vadd.xlane.f32.xlu0 %v1080_v10  ;;  %1426 = vset.pattern.permute.xlu2 %v1468_v16 }
 0x4f2   :  { %1121 = vadd.xlane.f32.xlu2 %v1120_v9  ;;  %1425 = vset.pattern.permute.xlu1 %v1468_v16 }
 0x4f3   :  { %1427 = vset.pattern.permute.xlu0 %v1468_v16 }
 0x54f   :  { %v1119_v55 = vpop.xlane.xlu1 %1118 }
 0x550   :  { %v1123_v4 = vsel %vm1053_vm14, 0.0, %v1119_v55 }
 0x55d   :  { %v1079_v59 = vpop.xlane.xlu2 %1078 }
 0x55e   :  { %1452 = vrcp.f32 %v1079_v59  ;;  %v1094_v61 = vand.u32 2147483648, %v1079_v59  ;;  %v1092_v49 = vand.u32 2147483647, %v1079_v59  ;;  %vm1088_vm11 = vweird.f32 %v1079_v59 }
 0x560   :  { %v1095_v22 = vor.u32 1.1754944e-38, %v1094_v61  ;;  %vm1093_vm13 = vcmp.eq.f32.partialorder %v1092_v49, 8.507059e+37 }
 0x564   :  { %v1453_v23 = vpop.eup %1452  ;;  %v1082_v30 = vpop.xlane.xlu0 %1081 }
 0x565   :  { %v1084_v48 = vmul.f32 %v1453_v23, %v1079_v59  ;;  %1454 = vrcp.f32 %v1082_v30  ;;  %vm1089_vm9 = vweird.f32 %v1453_v23  ;;  %v1107_v7 = vand.u32 2147483647, %v1082_v30  ;;  %v1122_v59 = vpop.xlane.xlu2 %1121 }
 0x566   :  { %vm1090_vm8 = vmor %vm1088_vm11, %vm1089_vm9  ;;  %v1109_v45 = vand.u32 2147483648, %v1082_v30  ;;  %vm1103_vm3 = vweird.f32 %v1082_v30  ;;  %v1124_v44 = vsel %vm1053_vm14, 0.0, %v1122_v59 }
 0x567   :  { %v1085_v19 = vsub.f32 1.0, %v1084_v48  ;;  %vm1108_vm6 = vcmp.eq.f32.partialorder %v1107_v7, 8.507059e+37 }
 0x568   :  { %v1110_v54 = vor.u32 1.1754944e-38, %v1109_v45 }
 0x569   :  { %v1086_v31 = vmul.f32 %v1453_v23, %v1085_v19 }
 0x56b   :  { %v1087_v52 = vadd.f32 %v1453_v23, %v1086_v31  ;;  %v1455_v53 = vpop.eup %1454 }
 0x56c   :  { %v1099_v56 = vmul.f32 %v1455_v53, %v1082_v30  ;;  %vm1104_vm10 = vweird.f32 %v1455_v53 }
 0x56d   :  { %v1091_v58 = vsel %vm1090_vm8, %v1453_v23, %v1087_v52  ;;  %vm1105_vm5 = vmor %vm1103_vm3, %vm1104_vm10 }
 0x56e   :  { %v1096_v63 = vsel %vm1093_vm13, %v1095_v22, %v1091_v58  ;;  %v1100_v3 = vsub.f32 1.0, %v1099_v56 }
 0x56f   :  { %v1113_v1 = vmul.f32 %v1096_v63, %v2035_v11  ;;  %v1171_v2 = vmul.f32 %v1163_v62, %v1096_v63  ;;  %v1147_v9 = vmul.f32 %v1139_v20, %v1096_v63 }
 0x570   :  { %v1101_v10 = vmul.f32 %v1455_v53, %v1100_v3  ;;  %v2119_v3 = vld [vmem:[#allocation4 + $0x8] sm:$0xff] }
 0x571   :  { %v1125_v34 = vmul.f32 %v1123_v4, %v1113_v1  ;;  %v1173_v12 = vmul.f32 %v1171_v2, %v1123_v4  ;;  %v1149_v11 = vmul.f32 %v1147_v9, %v1123_v4 }
 0x572   :  { %v1102_v13 = vadd.f32 %v1455_v53, %v1101_v10 }
 0x573   :  { %v1127_v60 = vsub.f32 %v1995_v38, %v1125_v34  ;;  %v1175_v17 = vsub.f32 %v1999_v39, %v1173_v12  ;;  %v1151_v24 = vsub.f32 %v2003_v46, %v1149_v11 }
 0x574   :  { %v1106_v37 = vsel %vm1105_vm5, %v1455_v53, %v1102_v13 }
 0x575   :  { %v1129_v26 = vsel %vm1053_vm14, %v1113_v1, %v1127_v60  ;;  %v2079_v15 = vsel %vm1053_vm14, %v1171_v2, %v1175_v17  ;;  %v1111_v25 = vsel %vm1108_vm6, %v1110_v54, %v1106_v37  ;;  %v2092_v23 = vsel %vm1053_vm14, %v1147_v9, %v1151_v24  ;;  %v2122_v1 = vld [vmem:[#allocation4] sm:$0xff] }
 0x576   :  { %v1239_v38 = vsel %vm1180_vm12, %v1129_v26, 0.0  ;;  %v1183_v39 = vsel %vm1179_vm15, %v1129_v26, 0.0  ;;  %v1114_v27 = vmul.f32 %v1111_v25, %v2044_v14  ;;  %v1148_v46 = vmul.f32 %v1146_v28, %v1111_v25 }
 0x577   :  { %v1172_v32 = vmul.f32 %v1170_v18, %v1111_v25  ;;  %v1241_v43 = vsel %vm19_vm2, %v1239_v38, 0.0  ;;  %v1185_v33 = vsel %vm19_vm2, %v1183_v39, 0.0  ;;  %v1273_v2 = vsel %vm1179_vm15, %v2079_v15, 0.0 }
 0x578   :  { %1242 = vadd.xlane.f32.xlu2 %v1241_v43  ;;  %v1126_v48 = vmul.f32 %v1124_v44, %v1114_v27  ;;  %v1150_v30 = vmul.f32 %v1148_v46, %v1124_v44  ;;  %v1186_v41 = vrot.slane %v1185_v33, 4  ;;  %v1249_v36 = vsel %vm1179_vm15, %v2092_v23, 0.0 }
 0x579   :  { %v1174_v40 = vmul.f32 %v1172_v32, %v1124_v44  ;;  %v1275_v4 = vsel %vm25_vm4, %v1273_v2, 0.0  ;;  %v1251_v7 = vsel %vm22_vm0, %v1249_v36, 0.0 }
 0x57a   :  { %v1128_v14 = vsub.f32 %v2021_v29, %v1126_v48  ;;  %v1152_v21 = vsub.f32 %v2025_v57, %v1150_v30  ;;  %v1187_v19 = vadd.f32 %v1186_v41, %v1185_v33  ;;  %v1276_v16 = vrot.slane %v1275_v4, 4 }
 0x57b   :  { %v1176_v42 = vsub.f32 %v2032_v6, %v1174_v40  ;;  %v1252_v9 = vrot.slane %v1251_v7, 4 }
 0x57c   :  { %v1188_v31 = vrot.slane %v1187_v19, 2  ;;  %v1130_v49 = vsel %vm1053_vm14, %v1114_v27, %v1128_v14  ;;  %v2108_v57 = vsel %vm1053_vm14, %v1148_v46, %v1152_v21  ;;  %v1277_v12 = vadd.f32 %v1276_v16, %v1275_v4 }
 0x57d   :  { %v2099_v61 = vsel %vm1053_vm14, %v1172_v32, %v1176_v42  ;;  %v1184_v50 = vsel %vm1179_vm15, %v1130_v49, 0.0  ;;  %v1240_v47 = vsel %vm1180_vm12, %v1130_v49, 0.0  ;;  %v1250_v10 = vsel %vm1179_vm15, %v2108_v57, 0.0 }
 0x57e   :  { %v1189_v0 = vadd.f32 %v1188_v31, %v1187_v19  ;;  %v1192_v8 = vsel %vm19_vm2, %v1184_v50, 0.0  ;;  %v1244_v20 = vsel %vm19_vm2, %v1240_v47, 0.0  ;;  %v1274_v45 = vsel %vm1179_vm15, %v2099_v61, 0.0 }
 0x57f   :  { %v1193_v29 = vrot.slane %v1192_v8, 4  ;;  %v1282_v34 = vsel %vm25_vm4, %v1274_v45, 0.0  ;;  %v1258_v11 = vsel %vm22_vm0, %v1250_v10, 0.0  ;;  %v1253_v60 = vadd.f32 %v1252_v9, %v1251_v7 }
 0x580   :  { %v1190_v51 = vrot.slane %v1189_v0, 1  ;;  %v1283_v17 = vrot.slane %v1282_v34, 4  ;;  %v1259_v54 = vrot.slane %v1258_v11, 4  ;;  %v1278_v28 = vrot.slane %v1277_v12, 2 }
 0x581   :  { %v1194_v6 = vadd.f32 %v1193_v29, %v1192_v8  ;;  %v1254_v18 = vrot.slane %v1253_v60, 2 }
 0x582   :  { %v1191_v52 = vadd.f32 %v1190_v51, %v1189_v0  ;;  %v1284_v24 = vadd.f32 %v1283_v17, %v1282_v34  ;;  %v1260_v37 = vadd.f32 %v1259_v54, %v1258_v11  ;;  %v1279_v25 = vadd.f32 %v1278_v28, %v1277_v12 }
 0x583   :  { %v1195_v53 = vrot.slane %v1194_v6, 2  ;;  %v1255_v39 = vadd.f32 %v1254_v18, %v1253_v60 }
 0x584   :  { %v1201_v22 = vsel %vm1180_vm12, %v1191_v52, 0.0  ;;  %v1285_v27 = vrot.slane %v1284_v24, 2  ;;  %v1261_v32 = vrot.slane %v1260_v37, 2  ;;  %v1280_v44 = vrot.slane %v1279_v25, 1 }
 0x585   :  { %v1203_v55 = vsel %vm19_vm2, %v1201_v22, 0.0  ;;  %v1196_v56 = vadd.f32 %v1195_v53, %v1194_v6  ;;  %v1256_v30 = vrot.slane %v1255_v39, 1 }
 0x586   :  { %1204 = vadd.xlane.f32.xlu0 %v1203_v55  ;;  %v1286_v40 = vadd.f32 %v1285_v27, %v1284_v24  ;;  %v1262_v21 = vadd.f32 %v1261_v32, %v1260_v37  ;;  %v1281_v50 = vadd.f32 %v1280_v44, %v1279_v25 }
 0x587   :  { %v1197_v58 = vrot.slane %v1196_v56, 1  ;;  %v1257_v0 = vadd.f32 %v1256_v30, %v1255_v39 }
 0x588   :  { %v1287_v8 = vrot.slane %v1286_v40, 1  ;;  %v1263_v22 = vrot.slane %v1262_v21, 1 }
 0x589   :  { %v1198_v62 = vadd.f32 %v1197_v58, %v1196_v56 }
 0x58a   :  { %v1288_v4 = vadd.f32 %v1287_v8, %v1286_v40  ;;  %v1264_v45 = vadd.f32 %v1263_v22, %v1262_v21 }
 0x58b   :  { %v1202_v5 = vsel %vm1180_vm12, %v1198_v62, 0.0 }
 0x58c   :  { %v1206_v63 = vsel %vm19_vm2, %v1202_v5, 0.0 }
 0x58d   :  { %1207 = vadd.xlane.f32.xlu1 %v1206_v63 }
 0x58e   :  { %1245 = vadd.xlane.f32.xlu0 %v1244_v20 }
 0x590   :  { %1304 = vperm.xlu2 %1426, %v2119_v3  }
 0x5a6   :  { %1299 = vperm.xlu1 %1425, %v2122_v1  }
 0x5eb   :  { %v1243_v31 = vpop.xlane.xlu2 %1242 }
 0x5ec   :  { %v1247_v55 = vsel %vm1179_vm15, 0.0, %v1243_v31 }
 0x5f9   :  { %v1205_v13 = vpop.xlane.xlu0 %1204 }
 0x5fa   :  { %1456 = vrcp.f32 %v1205_v13  ;;  %v1220_v43 = vand.u32 2147483648, %v1205_v13  ;;  %v1218_v48 = vand.u32 2147483647, %v1205_v13  ;;  %vm1214_vm14 = vweird.f32 %v1205_v13 }
 0x5fc   :  { %v1221_v42 = vor.u32 1.1754944e-38, %v1220_v43  ;;  %vm1219_vm9 = vcmp.eq.f32.partialorder %v1218_v48, 8.507059e+37 }
 0x600   :  { %v1457_v59 = vpop.eup %1456  ;;  %v1208_v26 = vpop.xlane.xlu1 %1207 }
 0x601   :  { %v1210_v38 = vmul.f32 %v1457_v59, %v1205_v13  ;;  %1458 = vrcp.f32 %v1208_v26  ;;  %vm1215_vm2 = vweird.f32 %v1457_v59  ;;  %v1235_v6 = vand.u32 2147483648, %v1208_v26  ;;  %v1246_v36 = vpop.xlane.xlu0 %1245 }
 0x602   :  { %vm1216_vm7 = vmor %vm1214_vm14, %vm1215_vm2  ;;  %v1233_v58 = vand.u32 2147483647, %v1208_v26  ;;  %vm1229_vm8 = vweird.f32 %v1208_v26 }
 0x603   :  { %v1211_v46 = vsub.f32 1.0, %v1210_v38  ;;  %v1236_v63 = vor.u32 1.1754944e-38, %v1235_v6  ;;  %v1340_v38 = vstv %s1339_s30 }
 0x604   :  { %vm1234_vm10 = vcmp.eq.f32.partialorder %v1233_v58, 8.507059e+37 }
 0x605   :  { %v1212_v33 = vmul.f32 %v1457_v59, %v1211_v46 }
 0x607   :  { %v1459_v41 = vpop.eup %1458  ;;  %v1213_v14 = vadd.f32 %v1457_v59, %v1212_v33 }
 0x608   :  { %v1225_v19 = vmul.f32 %v1459_v41, %v1208_v26  ;;  %vm1230_vm11 = vweird.f32 %v1459_v41 }
 0x609   :  { %v1217_v49 = vsel %vm1216_vm7, %v1457_v59, %v1213_v14  ;;  %vm1231_vm13 = vmor %vm1229_vm8, %vm1230_vm11 }
 0x60a   :  { %v1226_v29 = vsub.f32 1.0, %v1225_v19  ;;  %v1222_v51 = vsel %vm1219_vm9, %v1221_v42, %v1217_v49 }
 0x60b   :  { %v1289_v52 = vmul.f32 %v1281_v50, %v1222_v51  ;;  %v1265_v53 = vmul.f32 %v1257_v0, %v1222_v51 }
 0x60c   :  { %v1227_v56 = vmul.f32 %v1459_v41, %v1226_v29 }
 0x60d   :  { %v1291_v62 = vmul.f32 %v1289_v52, %v1247_v55  ;;  %v1267_v47 = vmul.f32 %v1265_v53, %v1247_v55 }
 0x60e   :  { %v1228_v5 = vadd.f32 %v1459_v41, %v1227_v56  ;;  %v1344_v56 = vld [vmem:[#allocation5 + $0x1] sm:$0x1] }
 0x60f   :  { %v1293_v20 = vsub.f32 %v2079_v15, %v1291_v62  ;;  %v1269_v2 = vsub.f32 %v2092_v23, %v1267_v47  ;;  %v1248_v23 = vsel %vm1179_vm15, 0.0, %v1246_v36 }
 0x610   :  { %v1232_v7 = vsel %vm1231_vm13, %v1459_v41, %v1228_v5 }
 0x611   :  { %v1237_v16 = vsel %vm1234_vm10, %v1236_v63, %v1232_v7  ;;  %v1295_v9 = vsel %vm1179_vm15, %v1289_v52, %v1293_v20  ;;  %v2149_v10 = vsel %vm1179_vm15, %v1265_v53, %v1269_v2 }
 0x612   :  { %v1290_v34 = vmul.f32 %v1288_v4, %v1237_v16  ;;  %1389 = vperm.xlu1 %1425, %v1295_v9   ;;  %v1323_v12 = vmul.f32 %v2122_v1, %v1295_v9  ;;  %v1266_v15 = vmul.f32 %v1264_v45, %v1237_v16 }
 0x614   :  { %v1292_v11 = vmul.f32 %v1290_v34, %v1248_v23  ;;  %v1325_v13 = vsel %vm25_vm4, %v1323_v12, 0.0  ;;  %v1268_v60 = vmul.f32 %v1266_v15, %v1248_v23 }
 0x615   :  { %v1326_v17 = vrot.slane %v1325_v13, 4 }
 0x616   :  { %v1294_v54 = vsub.f32 %v2099_v61, %v1292_v11  ;;  %v1270_v28 = vsub.f32 %v2108_v57, %v1268_v60 }
 0x617   :  { %v1327_v18 = vadd.f32 %v1326_v17, %v1325_v13 }
 0x618   :  { %v1296_v24 = vsel %vm1179_vm15, %v1290_v34, %v1294_v54  ;;  %v2161_v1 = vsel %vm1179_vm15, %v1266_v15, %v1270_v28  ;;  %v1300_v14 = vpop.permute.xlu1 %1299  ;;  %v1343_v54 = vld [vmem:[#allocation5] sm:$0x1] }
 0x619   :  { %v1328_v37 = vrot.slane %v1327_v18, 2  ;;  %v1324_v59 = vmul.f32 %v2119_v3, %v1296_v24  ;;  %v1305_v3 = vpop.permute.xlu2 %1304  ;;  %v1307_v19 = vmul.f32 %v1300_v14, %v2149_v10 }
 0x61a   :  { %v1308_v48 = vmul.f32 %v1305_v3, %v2161_v1 }
 0x61b   :  { %v1329_v26 = vadd.f32 %v1328_v37, %v1327_v18  ;;  %v1332_v61 = vsel %vm25_vm4, %v1324_v59, 0.0  ;;  %v1309_v49 = vsel %vm22_vm0, %v1307_v19, 0.0 }
 0x61c   :  { %v1333_v25 = vrot.slane %v1332_v61, 4  ;;  %v1316_v30 = vsel %vm22_vm0, %v1308_v48, 0.0  ;;  %v1310_v29 = vrot.slane %v1309_v49, 4 }
 0x61d   :  { %v1330_v57 = vrot.slane %v1329_v26, 1  ;;  %v1317_v40 = vrot.slane %v1316_v30, 4 }
 0x61e   :  { %v1334_v39 = vadd.f32 %v1333_v25, %v1332_v61  ;;  %v1311_v55 = vadd.f32 %v1310_v29, %v1309_v49 }
 0x61f   :  { %v1331_v27 = vadd.f32 %v1330_v57, %v1329_v26  ;;  %v1318_v41 = vadd.f32 %v1317_v40, %v1316_v30 }
 0x620   :  { %v1335_v46 = vrot.slane %v1334_v39, 2  ;;  %v1312_v63 = vrot.slane %v1311_v55, 2 }
 0x621   :  { %v1341_v32 = vsub.f32 %v1340_v38, %v1331_v27  ;;  %v1319_v42 = vrot.slane %v1318_v41, 2 }
 0x622   :  { %v1336_v35 = vadd.f32 %v1335_v46, %v1334_v39  ;;  %v1313_v7 = vadd.f32 %v1312_v63, %v1311_v55 }
 0x623   :  { %1349 = vperm.xlu0 %1427, %v1341_v32   ;;  %v1320_v31 = vadd.f32 %v1319_v42, %v1318_v41 }
 0x624   :  { %v1337_v43 = vrot.slane %v1336_v35, 1  ;;  %v1314_v12 = vrot.slane %v1313_v7, 1 }
 0x625   :  { %v1321_v8 = vrot.slane %v1320_v31, 1 }
 0x626   :  { %v1338_v44 = vadd.f32 %v1337_v43, %v1336_v35  ;;  %v1315_v13 = vadd.f32 %v1314_v12, %v1313_v7 }
 0x627   :  { %v1322_v53 = vadd.f32 %v1321_v8, %v1320_v31 }
 0x628   :  { %v1342_v33 = vsub.f32 %v1340_v38, %v1338_v44 }
 0x629   :  { %v1346_v47 = vsub.f32 %v1344_v56, %v1322_v53 }
 0x62a   :  { %1354 = vperm.xlu2 %1426, %v1342_v33  }
 0x632   :  { %1394 = vperm.xlu2 %1426, %v1296_v24   ;;  %v1345_v24 = vsub.f32 %v1343_v54, %v1315_v13 }
 0x684   :  { %v1355_v21 = vpop.permute.xlu2 %1354  ;;  %v1390_v61 = vpop.permute.xlu1 %1389 }
 0x685   :  { %1460 = vrcp.f32 %v1355_v21  ;;  %v1383_v6 = vand.u32 2147483648, %v1355_v21  ;;  %v1381_v22 = vand.u32 2147483647, %v1355_v21  ;;  %vm1377_vm15 = vweird.f32 %v1355_v21 }
 0x687   :  { %v1384_v62 = vor.u32 1.1754944e-38, %v1383_v6  ;;  %vm1382_vm3 = vcmp.eq.f32.partialorder %v1381_v22, 8.507059e+37 }
 0x68b   :  { %v1461_v50 = vpop.eup %1460 }
 0x68c   :  { %v1373_v0 = vmul.f32 %v1461_v50, %v1355_v21  ;;  %vm1378_vm4 = vweird.f32 %v1461_v50  ;;  %v1395_v45 = vpop.permute.xlu2 %1394 }
 0x68d   :  { %vm1379_vm12 = vmor %vm1377_vm15, %vm1378_vm4 }
 0x68e   :  { %v1374_v51 = vsub.f32 1.0, %v1373_v0 }
 0x690   :  { %v1375_v52 = vmul.f32 %v1461_v50, %v1374_v51 }
 0x692   :  { %v1376_v58 = vadd.f32 %v1461_v50, %v1375_v52 }
 0x694   :  { %v1380_v5 = vsel %vm1379_vm12, %v1461_v50, %v1376_v58 }
 0x695   :  { %v1385_v20 = vsel %vm1382_vm3, %v1384_v62, %v1380_v5  ;;  %v1350_v2 = vpop.permute.xlu0 %1349 }
 0x696   :  { %v1386_v36 = vmul.f32 %v1385_v20, %v1346_v47  ;;  %1462 = vrcp.f32 %v1350_v2  ;;  %v1368_v11 = vand.u32 2147483648, %v1350_v2  ;;  %v1366_v17 = vand.u32 2147483647, %v1350_v2 }
 0x697   :  { %vm1362_vm6 = vweird.f32 %v1350_v2 }
 0x698   :  { %v1400_v4 = vperm.slane %v1386_v36, 0  ;;  %1410 = vst.msk [vmem:[%s2193_s3 + $0x18] sm:$0x1] %vm28_vm1, %v1386_v36  ;;  %v1369_v18 = vor.u32 1.1754944e-38, %v1368_v11  ;;  %vm1367_vm14 = vcmp.eq.f32.partialorder %v1366_v17, 8.507059e+37 }
 0x69a   :  { %v1404_v16 = vmul.f32 %v1400_v4, %v1395_v45 }
 0x69c   :  { %v1463_v9 = vpop.eup %1462  ;;  %v1406_v34 = vsub.f32 %v2161_v1, %v1404_v16 }
 0x69d   :  { %v1358_v15 = vmul.f32 %v1463_v9, %v1350_v2  ;;  %vm1363_vm5 = vweird.f32 %v1463_v9 }
 0x69e   :  { %1408 = vst.msk [vmem:[%s2193_s3 + $0x10] sm:$0xff] %vm22_vm0, %v1406_v34  ;;  %vm1364_vm2 = vmor %vm1362_vm6, %vm1363_vm5 }
 0x69f   :  { %v1359_v23 = vsub.f32 1.0, %v1358_v15 }
 0x6a1   :  { %v1360_v60 = vmul.f32 %v1463_v9, %v1359_v23 }
 0x6a3   :  { %v1361_v28 = vadd.f32 %v1463_v9, %v1360_v60 }
 0x6a5   :  { %v1365_v1 = vsel %vm1364_vm2, %v1463_v9, %v1361_v28 }
 0x6a6   :  { %v1370_v37 = vsel %vm1367_vm14, %v1369_v18, %v1365_v1 }
 0x6a7   :  { %v1371_v59 = vmul.f32 %v1370_v37, %v1345_v24 }
 0x6a9   :  { %v1399_v26 = vperm.slane %v1371_v59, 0  ;;  %1409 = vst.msk [vmem:[%s2193_s3 + $0x8] sm:$0x1] %vm28_vm1, %v1371_v59 }
 0x6ab   :  { %v1403_v25 = vmul.f32 %v1399_v26, %v1390_v61 }
 0x6ad   :  { %v1405_v57 = vsub.f32 %v2149_v10, %v1403_v25 }
 0x6af   :  { %1407 = vst.msk [vmem:[%s2193_s3] sm:$0xff] %vm22_vm0, %v1405_v57 }

</bundles_post_ra>
